<compile_context>
chip_gen: v6e
topology: v6e:2x2x1
jax: 0.10.0
libtpu: 0.0.40
codegen_flags: <defaults>
</compile_context>

<pallas_src>
import functools

import jax
import jax.numpy as jnp
from jax.experimental import pallas as pl
from jax.experimental.pallas import tpu as pltpu


def _erf(z):
    # Abramowitz & Stegun 7.1.26 polynomial (|err| < 1.5e-7) — matches the
    # exact-erf nn.GELU far below the kernel tolerance, Mosaic-safe ops only.
    # The 1/(1+p*|z|) divide goes to the EUP slot via approx reciprocal.
    a1, a2, a3 = 0.254829592, -0.284496736, 1.421413741
    a4, a5, p = -1.453152027, 1.061405429, 0.3275911
    za = jnp.abs(z)
    t = pl.reciprocal(1.0 + p * za, approx=True)
    poly = ((((a5 * t + a4) * t + a3) * t + a2) * t + a1) * t
    y = 1.0 - poly * jnp.exp(-za * za)
    return jnp.where(z < 0, -y, y)


def transformer_v3_kernel(q_ref, k_ref, v_ref,
                          wq_ref, wk_ref, wv_ref, wo_ref, bo_ref,
                          gamma_ref, beta_ref,
                          w1_ref, b1_ref, w2_ref, b2_ref,
                          o_ref,
                          kh_ref, vh_ref, *, eps):
    """One (batch, query-tile) grid point: pre-norm attention + FFN, fused."""
    gamma = gamma_ref[...]                      # (1, D)
    beta = beta_ref[...]                        # (1, D)
    bf16 = jnp.bfloat16

    def layer_norm(x):                          # PyTorch LayerNorm (biased var)
        mean = jnp.mean(x, axis=-1, keepdims=True)
        var = jnp.mean((x - mean) ** 2, axis=-1, keepdims=True)
        return (x - mean) * jax.lax.rsqrt(var + eps) * gamma + beta

    # --- K/V path: LayerNorm + to_k / to_v, computed once per batch element ---
    # Scratch persists across grid steps; the query-tile axis is "arbitrary",
    # so the bf16 cache written at t == 0 is valid for every query tile of the
    # current batch element (k/v block index only changes with the batch axis).
    @pl.when(pl.program_id(1) == 0)
    def _compute_kv_cache():
        kn = layer_norm(k_ref[...]).astype(bf16)              # (NK, D)
        vn = layer_norm(v_ref[...]).astype(bf16)
        kh_ref[...] = jnp.dot(kn, wk_ref[...],
                              preferred_element_type=jnp.float32).astype(bf16)
        vh_ref[...] = jnp.dot(vn, wv_ref[...],
                              preferred_element_type=jnp.float32).astype(bf16)

    # --- Q path ----------------------------------------------------------------
    q_in = q_ref[...]                           # (TQ, D) f32, residual source
    qn = layer_norm(q_in).astype(bf16)
    # W_q already carries the softmax scale (folded in the wrapper).
    qh = jnp.dot(qn, wq_ref[...], preferred_element_type=jnp.float32)   # (TQ, inner)
    q_s = qh.astype(bf16)

    # scores: contract last dims directly (no materialized K transpose).
    dots = jnp.einsum('qd,kd->qk', q_s, kh_ref[...],
                      preferred_element_type=jnp.float32)               # (TQ, NK)

    # stable softmax; the divide goes to the EUP via approx reciprocal.
    dots = dots - jnp.max(dots, axis=-1, keepdims=True)
    e = jnp.exp(dots)
    attn = e * pl.reciprocal(jnp.sum(e, axis=-1, keepdims=True), approx=True)

    out = jnp.dot(attn.astype(bf16), vh_ref[...],
                  preferred_element_type=jnp.float32)                   # (TQ, inner)

    # to_out: Linear(inner, dim) + bias, then the PreNorm residual (+ original q).
    proj = jnp.dot(out.astype(bf16), wo_ref[...],
                   preferred_element_type=jnp.float32) + bo_ref[...]
    x = proj + q_in                                                     # (TQ, D)

    # FeedForward: Linear -> GELU (exact erf) -> Linear, + residual. f32 epilogue.
    h = jnp.dot(x.astype(bf16), w1_ref[...],
                preferred_element_type=jnp.float32) + b1_ref[...]
    h = 0.5 * h * (1.0 + _erf(h * 0.7071067811865476))
    y = jnp.dot(h.astype(bf16), w2_ref[...],
                preferred_element_type=jnp.float32) + b2_ref[...]

    o_ref[...] = (y + x).astype(o_ref.dtype)


def transformer_v3(q, k, v, wq, wk, wv, wo, bo, gamma, beta, w1, b1, w2, b2,
                   *, dim_head, eps=1e-5, block_q=256):
    B, Nq, D = q.shape
    _, Nk, _ = k.shape
    inner = wq.shape[1]
    mlp = w1.shape[1]
    scale = dim_head ** -0.5
    tq = Nq if Nq <= block_q else block_q
    assert Nq % tq == 0, "sequence length must be divisible by the query tile"

    bf16 = jnp.bfloat16
    kernel = functools.partial(transformer_v3_kernel, eps=eps)

    # Rough per-core VMEM budget: double-buffered I/O blocks + resident weights
    # (double-buffered by default) + bf16 K/V cache scratch + live temporaries.
    blocks = (
        2 * tq * D * 4 + 2 * Nk * D * 4                     # q/out tiles, k/v blocks (f32)
        + 3 * D * inner * 2 + inner * D * 2                 # wq/wk/wv/wo (bf16)
        + D * mlp * 2 + mlp * D * 2                         # w1/w2 (bf16)
        + 4 * D * 4 + mlp * 4                               # biases + LN params (f32)
    )
    scratch = 2 * Nk * inner * 2                            # bf16 kh/vh cache
    temps = tq * Nk * 4 + tq * mlp * 4 + 3 * tq * inner * 4
    vmem_limit = int(min(100 * 2**20,
                         max(32 * 2**20, 2 * (2 * blocks + scratch + temps))))

    return pl.pallas_call(
        kernel,
        out_shape=jax.ShapeDtypeStruct((B, Nq, D), q.dtype),
        grid=(B, Nq // tq),
        in_specs=[
            pl.BlockSpec((pl.Squeezed(), tq, D), lambda b, t: (b, t, 0)),   # q tile
            pl.BlockSpec((pl.Squeezed(), Nk, D), lambda b, t: (b, 0, 0)),   # k (full seq)
            pl.BlockSpec((pl.Squeezed(), Nk, D), lambda b, t: (b, 0, 0)),   # v (full seq)
            pl.BlockSpec((D, inner), lambda b, t: (0, 0)),                  # W_q (scaled)
            pl.BlockSpec((D, inner), lambda b, t: (0, 0)),                  # W_k
            pl.BlockSpec((D, inner), lambda b, t: (0, 0)),                  # W_v
            pl.BlockSpec((inner, D), lambda b, t: (0, 0)),                  # W_out
            pl.BlockSpec((1, D), lambda b, t: (0, 0)),                      # b_out
            pl.BlockSpec((1, D), lambda b, t: (0, 0)),                      # LN gamma
            pl.BlockSpec((1, D), lambda b, t: (0, 0)),                      # LN beta
            pl.BlockSpec((D, mlp), lambda b, t: (0, 0)),                    # FF W1
            pl.BlockSpec((1, mlp), lambda b, t: (0, 0)),                    # FF b1
            pl.BlockSpec((mlp, D), lambda b, t: (0, 0)),                    # FF W2
            pl.BlockSpec((1, D), lambda b, t: (0, 0)),                      # FF b2
        ],
        out_specs=pl.BlockSpec((pl.Squeezed(), tq, D), lambda b, t: (b, t, 0)),
        scratch_shapes=[pltpu.VMEM((Nk, inner), bf16),                      # kh cache
                        pltpu.VMEM((Nk, inner), bf16)],                     # vh cache
        compiler_params=pltpu.CompilerParams(
            dimension_semantics=("parallel", "arbitrary"),
            vmem_limit_bytes=vmem_limit),
    )(q, k, v,
      (wq * scale).astype(bf16), wk.astype(bf16), wv.astype(bf16), wo.astype(bf16),
      bo, gamma, beta,
      w1.astype(bf16), b1, w2.astype(bf16), b2)


def reference(q, k, v, wq, wk, wv, wo, bo, gamma, beta, w1, b1, w2, b2,
              *, dim_head, eps=1e-5):
    """Pure-JAX f32 reference of Transformer_v3 (depth=1, eval mode)."""
    scale = dim_head ** -0.5

    def ln(x):
        mean = jnp.mean(x, axis=-1, keepdims=True)
        var = jnp.mean((x - mean) ** 2, axis=-1, keepdims=True)
        return (x - mean) * jax.lax.rsqrt(var + eps) * gamma[0] + beta[0]

    qh = jnp.einsum('bnd,df->bnf', ln(q), wq)
    kh = jnp.einsum('bnd,df->bnf', ln(k), wk)
    vh = jnp.einsum('bnd,df->bnf', ln(v), wv)
    dots = jnp.einsum('bid,bjd->bij', qh, kh) * scale
    attn = jax.nn.softmax(dots, axis=-1)
    out = jnp.einsum('bij,bjd->bid', attn, vh)
    proj = jnp.einsum('bnf,fd->bnd', out, wo) + bo[0]
    x = proj + q
    h = jnp.einsum('bnd,dm->bnm', x, w1) + b1[0]
    h = jax.nn.gelu(h, approximate=False)     # PyTorch nn.GELU (exact erf)
    y = jnp.einsum('bnm,md->bnd', h, w2) + b2[0]
    return y + x


if __name__ == "__main__":
    # Small shapes consistent with the module (scaled down from dim=2048),
    # keeping D / inner / mlp lane-dense multiples of 128.
    B, N, D = 2, 8, 256
    heads, dim_head = 4, 64
    inner = heads * dim_head
    mlp = 256

    key = jax.random.PRNGKey(0)
    ks = jax.random.split(key, 12)
    q = jax.random.normal(ks[0], (B, N, D), jnp.float32)
    k = jax.random.normal(ks[1], (B, N, D), jnp.float32)
    v = jax.random.normal(ks[2], (B, N, D), jnp.float32)
    wq = jax.random.normal(ks[3], (D, inner), jnp.float32) * 0.05
    wk = jax.random.normal(ks[4], (D, inner), jnp.float32) * 0.05
    wv = jax.random.normal(ks[5], (D, inner), jnp.float32) * 0.05
    wo = jax.random.normal(ks[6], (inner, D), jnp.float32) * 0.05
    bo = jax.random.normal(ks[7], (1, D), jnp.float32) * 0.01
    gamma = jnp.ones((1, D), jnp.float32)     # nn.LayerNorm default init
    beta = jnp.zeros((1, D), jnp.float32)
    w1 = jax.random.normal(ks[8], (D, mlp), jnp.float32) * 0.05
    b1 = jax.random.normal(ks[9], (1, mlp), jnp.float32) * 0.01
    w2 = jax.random.normal(ks[10], (mlp, D), jnp.float32) * 0.05
    b2 = jax.random.normal(ks[11], (1, D), jnp.float32) * 0.01

    out = transformer_v3(q, k, v, wq, wk, wv, wo, bo, gamma, beta,
                         w1, b1, w2, b2, dim_head=dim_head)
    out = jax.block_until_ready(out)

    ref = reference(q, k, v, wq, wk, wv, wo, bo, gamma, beta,
                    w1, b1, w2, b2, dim_head=dim_head)
    max_err = jnp.max(jnp.abs(out - ref))
    # bf16 MXU inputs + approx reciprocals: loosened tolerance vs f32 reference.
    assert jnp.allclose(out, ref, atol=5e-2, rtol=5e-2), (
        f"mismatch vs reference, max abs err={max_err}")

    print("KERNEL_OK")
</pallas_src>

<mosaic_0001>
module attributes {stable_mosaic.version = 11 : i64} {
  func.func @transformer_v3_kernel(%arg0: i32, %arg1: i32, %arg2: memref<1x8x256xf32, #tpu.memory_space<vmem>>, %arg3: memref<1x8x256xf32, #tpu.memory_space<vmem>>, %arg4: memref<1x8x256xf32, #tpu.memory_space<vmem>>, %arg5: memref<256x256xbf16, #tpu.memory_space<vmem>>, %arg6: memref<256x256xbf16, #tpu.memory_space<vmem>>, %arg7: memref<256x256xbf16, #tpu.memory_space<vmem>>, %arg8: memref<256x256xbf16, #tpu.memory_space<vmem>>, %arg9: memref<1x256xf32, #tpu.memory_space<vmem>>, %arg10: memref<1x256xf32, #tpu.memory_space<vmem>>, %arg11: memref<1x256xf32, #tpu.memory_space<vmem>>, %arg12: memref<256x256xbf16, #tpu.memory_space<vmem>>, %arg13: memref<1x256xf32, #tpu.memory_space<vmem>>, %arg14: memref<256x256xbf16, #tpu.memory_space<vmem>>, %arg15: memref<1x256xf32, #tpu.memory_space<vmem>>, %arg16: memref<1x8x256xf32, #tpu.memory_space<vmem>>, %arg17: memref<8x256xbf16, #tpu.memory_space<vmem>>, %arg18: memref<8x256xbf16, #tpu.memory_space<vmem>>) attributes {dimension_semantics = [#tpu.dimension_semantics<parallel>, #tpu.dimension_semantics<arbitrary>], iteration_bounds = array<i64: 2, 1>, scalar_prefetch = 0 : i64, scratch_operands = 2 : i64, tpu.core_type = #tpu.core_type<tc>, window_params = [{transform_indices = @transform_0, window_bounds = array<i64: 1, 8, 256>}, {transform_indices = @transform_1, window_bounds = array<i64: 1, 8, 256>}, {transform_indices = @transform_2, window_bounds = array<i64: 1, 8, 256>}, {pipeline_mode = #tpu.pipeline_mode<synchronous>, transform_indices = @transform_3, window_bounds = array<i64: 256, 256>}, {pipeline_mode = #tpu.pipeline_mode<synchronous>, transform_indices = @transform_4, window_bounds = array<i64: 256, 256>}, {pipeline_mode = #tpu.pipeline_mode<synchronous>, transform_indices = @transform_5, window_bounds = array<i64: 256, 256>}, {pipeline_mode = #tpu.pipeline_mode<synchronous>, transform_indices = @transform_6, window_bounds = array<i64: 256, 256>}, {pipeline_mode = #tpu.pipeline_mode<synchronous>, transform_indices = @transform_7, window_bounds = array<i64: 1, 256>}, {pipeline_mode = #tpu.pipeline_mode<synchronous>, transform_indices = @transform_8, window_bounds = array<i64: 1, 256>}, {pipeline_mode = #tpu.pipeline_mode<synchronous>, transform_indices = @transform_9, window_bounds = array<i64: 1, 256>}, {pipeline_mode = #tpu.pipeline_mode<synchronous>, transform_indices = @transform_10, window_bounds = array<i64: 256, 256>}, {pipeline_mode = #tpu.pipeline_mode<synchronous>, transform_indices = @transform_11, window_bounds = array<i64: 1, 256>}, {pipeline_mode = #tpu.pipeline_mode<synchronous>, transform_indices = @transform_12, window_bounds = array<i64: 256, 256>}, {pipeline_mode = #tpu.pipeline_mode<synchronous>, transform_indices = @transform_13, window_bounds = array<i64: 1, 256>}, {transform_indices = @transform_14, window_bounds = array<i64: 1, 8, 256>}]} {
    %c0 = arith.constant 0 : index
    %c0_0 = arith.constant 0 : index
    %0 = vector.load %arg10[%c0, %c0_0] : memref<1x256xf32, #tpu.memory_space<vmem>>, vector<1x256xf32>
    %c0_1 = arith.constant 0 : index
    %c0_2 = arith.constant 0 : index
    %1 = vector.load %arg11[%c0_1, %c0_2] : memref<1x256xf32, #tpu.memory_space<vmem>>, vector<1x256xf32>
    %c0_i32 = arith.constant 0 : i32
    %2 = arith.cmpi eq, %arg1, %c0_i32 : i32
    %3 = arith.extui %2 : i1 to i32
    %c0_i32_3 = arith.constant 0 : i32
    %4 = arith.cmpi ne, %3, %c0_i32_3 : i32
    scf.if %4 {
      %c0_54 = arith.constant 0 : index
      %c0_55 = arith.constant 0 : index
      %c0_56 = arith.constant 0 : index
      %110 = vector.load %arg3[%c0_54, %c0_55, %c0_56] : memref<1x8x256xf32, #tpu.memory_space<vmem>>, vector<1x8x256xf32>
      %111 = vector.shape_cast %110 : vector<1x8x256xf32> to vector<8x256xf32>
      %cst_57 = arith.constant dense<0.000000e+00> : vector<8xf32>
      %112 = vector.multi_reduction <add>, %111, %cst_57 [1] : vector<8x256xf32> to vector<8xf32>
      %113 = vector.shape_cast %112 : vector<8xf32> to vector<8x1xf32>
      %cst_58 = arith.constant 2.560000e+02 : f32
      %114 = vector.broadcast %cst_58 : f32 to vector<8x1xf32>
      %115 = arith.divf %113, %114 : vector<8x1xf32>
      %116 = vector.broadcast %115 : vector<8x1xf32> to vector<8x256xf32>
      %117 = arith.subf %111, %116 : vector<8x256xf32>
      %118 = arith.mulf %117, %117 : vector<8x256xf32>
      %cst_59 = arith.constant dense<0.000000e+00> : vector<8xf32>
      %119 = vector.multi_reduction <add>, %118, %cst_59 [1] : vector<8x256xf32> to vector<8xf32>
      %120 = vector.shape_cast %119 : vector<8xf32> to vector<8x1xf32>
      %cst_60 = arith.constant 2.560000e+02 : f32
      %121 = vector.broadcast %cst_60 : f32 to vector<8x1xf32>
      %122 = arith.divf %120, %121 : vector<8x1xf32>
      %123 = vector.broadcast %115 : vector<8x1xf32> to vector<8x256xf32>
      %124 = arith.subf %111, %123 : vector<8x256xf32>
      %cst_61 = arith.constant 9.99999974E-6 : f32
      %125 = vector.broadcast %cst_61 : f32 to vector<8x1xf32>
      %126 = arith.addf %122, %125 : vector<8x1xf32>
      %127 = math.rsqrt %126 : vector<8x1xf32>
      %128 = vector.broadcast %127 : vector<8x1xf32> to vector<8x256xf32>
      %129 = arith.mulf %124, %128 : vector<8x256xf32>
      %130 = vector.broadcast %0 : vector<1x256xf32> to vector<8x256xf32>
      %131 = arith.mulf %129, %130 : vector<8x256xf32>
      %132 = vector.broadcast %1 : vector<1x256xf32> to vector<8x256xf32>
      %133 = arith.addf %131, %132 : vector<8x256xf32>
      %134 = arith.truncf %133 : vector<8x256xf32> to vector<8x256xbf16>
      %c0_62 = arith.constant 0 : index
      %c0_63 = arith.constant 0 : index
      %c0_64 = arith.constant 0 : index
      %135 = vector.load %arg4[%c0_62, %c0_63, %c0_64] : memref<1x8x256xf32, #tpu.memory_space<vmem>>, vector<1x8x256xf32>
      %136 = vector.shape_cast %135 : vector<1x8x256xf32> to vector<8x256xf32>
      %cst_65 = arith.constant dense<0.000000e+00> : vector<8xf32>
      %137 = vector.multi_reduction <add>, %136, %cst_65 [1] : vector<8x256xf32> to vector<8xf32>
      %138 = vector.shape_cast %137 : vector<8xf32> to vector<8x1xf32>
      %cst_66 = arith.constant 2.560000e+02 : f32
      %139 = vector.broadcast %cst_66 : f32 to vector<8x1xf32>
      %140 = arith.divf %138, %139 : vector<8x1xf32>
      %141 = vector.broadcast %140 : vector<8x1xf32> to vector<8x256xf32>
      %142 = arith.subf %136, %141 : vector<8x256xf32>
      %143 = arith.mulf %142, %142 : vector<8x256xf32>
      %cst_67 = arith.constant dense<0.000000e+00> : vector<8xf32>
      %144 = vector.multi_reduction <add>, %143, %cst_67 [1] : vector<8x256xf32> to vector<8xf32>
      %145 = vector.shape_cast %144 : vector<8xf32> to vector<8x1xf32>
      %cst_68 = arith.constant 2.560000e+02 : f32
      %146 = vector.broadcast %cst_68 : f32 to vector<8x1xf32>
      %147 = arith.divf %145, %146 : vector<8x1xf32>
      %148 = vector.broadcast %140 : vector<8x1xf32> to vector<8x256xf32>
      %149 = arith.subf %136, %148 : vector<8x256xf32>
      %cst_69 = arith.constant 9.99999974E-6 : f32
      %150 = vector.broadcast %cst_69 : f32 to vector<8x1xf32>
      %151 = arith.addf %147, %150 : vector<8x1xf32>
      %152 = math.rsqrt %151 : vector<8x1xf32>
      %153 = vector.broadcast %152 : vector<8x1xf32> to vector<8x256xf32>
      %154 = arith.mulf %149, %153 : vector<8x256xf32>
      %155 = vector.broadcast %0 : vector<1x256xf32> to vector<8x256xf32>
      %156 = arith.mulf %154, %155 : vector<8x256xf32>
      %157 = vector.broadcast %1 : vector<1x256xf32> to vector<8x256xf32>
      %158 = arith.addf %156, %157 : vector<8x256xf32>
      %159 = arith.truncf %158 : vector<8x256xf32> to vector<8x256xbf16>
      %c0_70 = arith.constant 0 : index
      %c0_71 = arith.constant 0 : index
      %160 = vector.load %arg6[%c0_70, %c0_71] : memref<256x256xbf16, #tpu.memory_space<vmem>>, vector<256x256xbf16>
      %cst_72 = arith.constant dense<0.000000e+00> : vector<8x256xf32>
      %161 = tpu.matmul %134, %160, %cst_72 {dimension_numbers = #tpu.dot_dimension_numbers<[1], [0], [0], [1], [0, 0, 1, 1], [], []>} : vector<8x256xbf16>, vector<256x256xbf16>, vector<8x256xf32> -> vector<8x256xf32>
      %162 = arith.truncf %161 : vector<8x256xf32> to vector<8x256xbf16>
      %c0_73 = arith.constant 0 : index
      %c0_74 = arith.constant 0 : index
      %163 = vector.load %arg17[%c0_73, %c0_74] : memref<8x256xbf16, #tpu.memory_space<vmem>>, vector<8x256xbf16>
      tpu.vector_store %arg17[%c0_73, %c0_74], %162 {strides = array<i32>} : memref<8x256xbf16, #tpu.memory_space<vmem>>, vector<8x256xbf16>,
      %c0_75 = arith.constant 0 : index
      %c0_76 = arith.constant 0 : index
      %164 = vector.load %arg7[%c0_75, %c0_76] : memref<256x256xbf16, #tpu.memory_space<vmem>>, vector<256x256xbf16>
      %cst_77 = arith.constant dense<0.000000e+00> : vector<8x256xf32>
      %165 = tpu.matmul %159, %164, %cst_77 {dimension_numbers = #tpu.dot_dimension_numbers<[1], [0], [0], [1], [0, 0, 1, 1], [], []>} : vector<8x256xbf16>, vector<256x256xbf16>, vector<8x256xf32> -> vector<8x256xf32>
      %166 = arith.truncf %165 : vector<8x256xf32> to vector<8x256xbf16>
      %c0_78 = arith.constant 0 : index
      %c0_79 = arith.constant 0 : index
      %167 = vector.load %arg18[%c0_78, %c0_79] : memref<8x256xbf16, #tpu.memory_space<vmem>>, vector<8x256xbf16>
      tpu.vector_store %arg18[%c0_78, %c0_79], %166 {strides = array<i32>} : memref<8x256xbf16, #tpu.memory_space<vmem>>, vector<8x256xbf16>,
    } else {
    }
    %c0_4 = arith.constant 0 : index
    %c0_5 = arith.constant 0 : index
    %c0_6 = arith.constant 0 : index
    %5 = vector.load %arg2[%c0_4, %c0_5, %c0_6] : memref<1x8x256xf32, #tpu.memory_space<vmem>>, vector<1x8x256xf32>
    %6 = vector.shape_cast %5 : vector<1x8x256xf32> to vector<8x256xf32>
    %cst = arith.constant dense<0.000000e+00> : vector<8xf32>
    %7 = vector.multi_reduction <add>, %6, %cst [1] : vector<8x256xf32> to vector<8xf32>
    %8 = vector.shape_cast %7 : vector<8xf32> to vector<8x1xf32>
    %cst_7 = arith.constant 2.560000e+02 : f32
    %9 = vector.broadcast %cst_7 : f32 to vector<8x1xf32>
    %10 = arith.divf %8, %9 : vector<8x1xf32>
    %11 = vector.broadcast %10 : vector<8x1xf32> to vector<8x256xf32>
    %12 = arith.subf %6, %11 : vector<8x256xf32>
    %13 = arith.mulf %12, %12 : vector<8x256xf32>
    %cst_8 = arith.constant dense<0.000000e+00> : vector<8xf32>
    %14 = vector.multi_reduction <add>, %13, %cst_8 [1] : vector<8x256xf32> to vector<8xf32>
    %15 = vector.shape_cast %14 : vector<8xf32> to vector<8x1xf32>
    %cst_9 = arith.constant 2.560000e+02 : f32
    %16 = vector.broadcast %cst_9 : f32 to vector<8x1xf32>
    %17 = arith.divf %15, %16 : vector<8x1xf32>
    %18 = vector.broadcast %10 : vector<8x1xf32> to vector<8x256xf32>
    %19 = arith.subf %6, %18 : vector<8x256xf32>
    %cst_10 = arith.constant 9.99999974E-6 : f32
    %20 = vector.broadcast %cst_10 : f32 to vector<8x1xf32>
    %21 = arith.addf %17, %20 : vector<8x1xf32>
    %22 = math.rsqrt %21 : vector<8x1xf32>
    %23 = vector.broadcast %22 : vector<8x1xf32> to vector<8x256xf32>
    %24 = arith.mulf %19, %23 : vector<8x256xf32>
    %25 = vector.broadcast %0 : vector<1x256xf32> to vector<8x256xf32>
    %26 = arith.mulf %24, %25 : vector<8x256xf32>
    %27 = vector.broadcast %1 : vector<1x256xf32> to vector<8x256xf32>
    %28 = arith.addf %26, %27 : vector<8x256xf32>
    %29 = arith.truncf %28 : vector<8x256xf32> to vector<8x256xbf16>
    %c0_11 = arith.constant 0 : index
    %c0_12 = arith.constant 0 : index
    %30 = vector.load %arg5[%c0_11, %c0_12] : memref<256x256xbf16, #tpu.memory_space<vmem>>, vector<256x256xbf16>
    %cst_13 = arith.constant dense<0.000000e+00> : vector<8x256xf32>
    %31 = tpu.matmul %29, %30, %cst_13 {dimension_numbers = #tpu.dot_dimension_numbers<[1], [0], [0], [1], [0, 0, 1, 1], [], []>} : vector<8x256xbf16>, vector<256x256xbf16>, vector<8x256xf32> -> vector<8x256xf32>
    %32 = arith.truncf %31 : vector<8x256xf32> to vector<8x256xbf16>
    %c0_14 = arith.constant 0 : index
    %c0_15 = arith.constant 0 : index
    %33 = vector.load %arg17[%c0_14, %c0_15] : memref<8x256xbf16, #tpu.memory_space<vmem>>, vector<8x256xbf16>
    "tpu.trace_start"() <{level = 10 : i32, message = "qd,kd->qk"}> : () -> ()
    %cst_16 = arith.constant dense<0.000000e+00> : vector<8x8xf32>
    %34 = tpu.matmul %32, %33, %cst_16 {dimension_numbers = #tpu.dot_dimension_numbers<[1], [1], [0], [0], [0, 0, 1, 0], [], []>} : vector<8x256xbf16>, vector<8x256xbf16>, vector<8x8xf32> -> vector<8x8xf32>
    "tpu.trace_stop"() : () -> ()
    %cst_17 = arith.constant dense<0xFF800000> : vector<8xf32>
    %35 = vector.multi_reduction <maximumf>, %34, %cst_17 [1] : vector<8x8xf32> to vector<8xf32>
    %36 = vector.shape_cast %35 : vector<8xf32> to vector<8x1xf32>
    %37 = vector.broadcast %36 : vector<8x1xf32> to vector<8x8xf32>
    %38 = arith.subf %34, %37 : vector<8x8xf32>
    %39 = math.exp %38 : vector<8x8xf32>
    %cst_18 = arith.constant dense<0.000000e+00> : vector<8xf32>
    %40 = vector.multi_reduction <add>, %39, %cst_18 [1] : vector<8x8xf32> to vector<8xf32>
    %41 = vector.shape_cast %40 : vector<8xf32> to vector<8x1xf32>
    %42 = tpu.reciprocal %41 {approx = true} : vector<8x1xf32> -> vector<8x1xf32>
    %43 = vector.broadcast %42 : vector<8x1xf32> to vector<8x8xf32>
    %44 = arith.mulf %39, %43 : vector<8x8xf32>
    %45 = arith.truncf %44 : vector<8x8xf32> to vector<8x8xbf16>
    %c0_19 = arith.constant 0 : index
    %c0_20 = arith.constant 0 : index
    %46 = vector.load %arg18[%c0_19, %c0_20] : memref<8x256xbf16, #tpu.memory_space<vmem>>, vector<8x256xbf16>
    %cst_21 = arith.constant dense<0.000000e+00> : vector<8x256xf32>
    %47 = tpu.matmul %45, %46, %cst_21 {dimension_numbers = #tpu.dot_dimension_numbers<[1], [0], [0], [1], [0, 0, 1, 1], [], []>} : vector<8x8xbf16>, vector<8x256xbf16>, vector<8x256xf32> -> vector<8x256xf32>
    %48 = arith.truncf %47 : vector<8x256xf32> to vector<8x256xbf16>
    %c0_22 = arith.constant 0 : index
    %c0_23 = arith.constant 0 : index
    %49 = vector.load %arg8[%c0_22, %c0_23] : memref<256x256xbf16, #tpu.memory_space<vmem>>, vector<256x256xbf16>
    %cst_24 = arith.constant dense<0.000000e+00> : vector<8x256xf32>
    %50 = tpu.matmul %48, %49, %cst_24 {dimension_numbers = #tpu.dot_dimension_numbers<[1], [0], [0], [1], [0, 0, 1, 1], [], []>} : vector<8x256xbf16>, vector<256x256xbf16>, vector<8x256xf32> -> vector<8x256xf32>
    %c0_25 = arith.constant 0 : index
    %c0_26 = arith.constant 0 : index
    %51 = vector.load %arg9[%c0_25, %c0_26] : memref<1x256xf32, #tpu.memory_space<vmem>>, vector<1x256xf32>
    %52 = vector.broadcast %51 : vector<1x256xf32> to vector<8x256xf32>
    %53 = arith.addf %50, %52 : vector<8x256xf32>
    %54 = arith.addf %53, %6 : vector<8x256xf32>
    %55 = arith.truncf %54 : vector<8x256xf32> to vector<8x256xbf16>
    %c0_27 = arith.constant 0 : index
    %c0_28 = arith.constant 0 : index
    %56 = vector.load %arg12[%c0_27, %c0_28] : memref<256x256xbf16, #tpu.memory_space<vmem>>, vector<256x256xbf16>
    %cst_29 = arith.constant dense<0.000000e+00> : vector<8x256xf32>
    %57 = tpu.matmul %55, %56, %cst_29 {dimension_numbers = #tpu.dot_dimension_numbers<[1], [0], [0], [1], [0, 0, 1, 1], [], []>} : vector<8x256xbf16>, vector<256x256xbf16>, vector<8x256xf32> -> vector<8x256xf32>
    %c0_30 = arith.constant 0 : index
    %c0_31 = arith.constant 0 : index
    %58 = vector.load %arg13[%c0_30, %c0_31] : memref<1x256xf32, #tpu.memory_space<vmem>>, vector<1x256xf32>
    %59 = vector.broadcast %58 : vector<1x256xf32> to vector<8x256xf32>
    %60 = arith.addf %57, %59 : vector<8x256xf32>
    %cst_32 = arith.constant 5.000000e-01 : f32
    %61 = vector.broadcast %cst_32 : f32 to vector<8x256xf32>
    %62 = arith.mulf %61, %60 : vector<8x256xf32>
    %cst_33 = arith.constant 0.707106769 : f32
    %63 = vector.broadcast %cst_33 : f32 to vector<8x256xf32>
    %64 = arith.mulf %60, %63 : vector<8x256xf32>
    %65 = math.absf %64 : vector<8x256xf32>
    %cst_34 = arith.constant 0.327591091 : f32
    %66 = vector.broadcast %cst_34 : f32 to vector<8x256xf32>
    %67 = arith.mulf %66, %65 : vector<8x256xf32>
    %cst_35 = arith.constant 1.000000e+00 : f32
    %68 = vector.broadcast %cst_35 : f32 to vector<8x256xf32>
    %69 = arith.addf %68, %67 : vector<8x256xf32>
    %70 = tpu.reciprocal %69 {approx = true} : vector<8x256xf32> -> vector<8x256xf32>
    %cst_36 = arith.constant 1.06140542 : f32
    %71 = vector.broadcast %cst_36 : f32 to vector<8x256xf32>
    %72 = arith.mulf %71, %70 : vector<8x256xf32>
    %cst_37 = arith.constant -1.45315206 : f32
    %73 = vector.broadcast %cst_37 : f32 to vector<8x256xf32>
    %74 = arith.addf %72, %73 : vector<8x256xf32>
    %75 = arith.mulf %74, %70 : vector<8x256xf32>
    %cst_38 = arith.constant 1.42141378 : f32
    %76 = vector.broadcast %cst_38 : f32 to vector<8x256xf32>
    %77 = arith.addf %75, %76 : vector<8x256xf32>
    %78 = arith.mulf %77, %70 : vector<8x256xf32>
    %cst_39 = arith.constant -0.284496725 : f32
    %79 = vector.broadcast %cst_39 : f32 to vector<8x256xf32>
    %80 = arith.addf %78, %79 : vector<8x256xf32>
    %81 = arith.mulf %80, %70 : vector<8x256xf32>
    %cst_40 = arith.constant 0.254829586 : f32
    %82 = vector.broadcast %cst_40 : f32 to vector<8x256xf32>
    %83 = arith.addf %81, %82 : vector<8x256xf32>
    %84 = arith.mulf %83, %70 : vector<8x256xf32>
    %cst_41 = arith.constant 0.000000e+00 : f32
    %85 = vector.broadcast %cst_41 : f32 to vector<8x256xf32>
    %86 = arith.subf %85, %65 : vector<8x256xf32>
    %87 = arith.mulf %86, %65 : vector<8x256xf32>
    %88 = math.exp %87 : vector<8x256xf32>
    %89 = arith.mulf %84, %88 : vector<8x256xf32>
    %cst_42 = arith.constant 1.000000e+00 : f32
    %90 = vector.broadcast %cst_42 : f32 to vector<8x256xf32>
    %91 = arith.subf %90, %89 : vector<8x256xf32>
    %cst_43 = arith.constant 0.000000e+00 : f32
    %92 = vector.broadcast %cst_43 : f32 to vector<8x256xf32>
    %93 = arith.cmpf olt, %64, %92 : vector<8x256xf32>
    %cst_44 = arith.constant 0.000000e+00 : f32
    %94 = vector.broadcast %cst_44 : f32 to vector<8x256xf32>
    %95 = arith.subf %94, %91 : vector<8x256xf32>
    %96 = arith.select %93, %95, %91 : vector<8x256xi1>, vector<8x256xf32>
    %cst_45 = arith.constant 1.000000e+00 : f32
    %97 = vector.broadcast %cst_45 : f32 to vector<8x256xf32>
    %98 = arith.addf %97, %96 : vector<8x256xf32>
    %99 = arith.mulf %62, %98 : vector<8x256xf32>
    %100 = arith.truncf %99 : vector<8x256xf32> to vector<8x256xbf16>
    %c0_46 = arith.constant 0 : index
    %c0_47 = arith.constant 0 : index
    %101 = vector.load %arg14[%c0_46, %c0_47] : memref<256x256xbf16, #tpu.memory_space<vmem>>, vector<256x256xbf16>
    %cst_48 = arith.constant dense<0.000000e+00> : vector<8x256xf32>
    %102 = tpu.matmul %100, %101, %cst_48 {dimension_numbers = #tpu.dot_dimension_numbers<[1], [0], [0], [1], [0, 0, 1, 1], [], []>} : vector<8x256xbf16>, vector<256x256xbf16>, vector<8x256xf32> -> vector<8x256xf32>
    %c0_49 = arith.constant 0 : index
    %c0_50 = arith.constant 0 : index
    %103 = vector.load %arg15[%c0_49, %c0_50] : memref<1x256xf32, #tpu.memory_space<vmem>>, vector<1x256xf32>
    %104 = vector.broadcast %103 : vector<1x256xf32> to vector<8x256xf32>
    %105 = arith.addf %102, %104 : vector<8x256xf32>
    %106 = arith.addf %105, %54 : vector<8x256xf32>
    %c0_51 = arith.constant 0 : index
    %c0_52 = arith.constant 0 : index
    %c0_53 = arith.constant 0 : index
    %107 = vector.load %arg16[%c0_51, %c0_52, %c0_53] : memref<1x8x256xf32, #tpu.memory_space<vmem>>, vector<1x8x256xf32>
    %108 = vector.shape_cast %107 : vector<1x8x256xf32> to vector<8x256xf32>
    %109 = vector.shape_cast %106 : vector<8x256xf32> to vector<1x8x256xf32>
    tpu.vector_store %arg16[%c0_51, %c0_52, %c0_53], %109 {strides = array<i32>} : memref<1x8x256xf32, #tpu.memory_space<vmem>>, vector<1x8x256xf32>,
    return
  }
  func.func @transform_0(%arg0: i32, %arg1: i32) -> (i32, i32, i32) {
    %c0_i32 = arith.constant 0 : i32
    %c0_i32_0 = arith.constant 0 : i32
    return %arg0, %arg1, %c0_i32 : i32, i32, i32
  }
  func.func @transform_1(%arg0: i32, %arg1: i32) -> (i32, i32, i32) {
    %c0_i32 = arith.constant 0 : i32
    %c0_i32_0 = arith.constant 0 : i32
    %c0_i32_1 = arith.constant 0 : i32
    return %arg0, %c0_i32, %c0_i32_0 : i32, i32, i32
  }
  func.func @transform_2(%arg0: i32, %arg1: i32) -> (i32, i32, i32) {
    %c0_i32 = arith.constant 0 : i32
    %c0_i32_0 = arith.constant 0 : i32
    %c0_i32_1 = arith.constant 0 : i32
    return %arg0, %c0_i32, %c0_i32_0 : i32, i32, i32
  }
  func.func @transform_3(%arg0: i32, %arg1: i32) -> (i32, i32) {
    %c0_i32 = arith.constant 0 : i32
    %c0_i32_0 = arith.constant 0 : i32
    %c0_i32_1 = arith.constant 0 : i32
    return %c0_i32, %c0_i32_0 : i32, i32
  }
  func.func @transform_4(%arg0: i32, %arg1: i32) -> (i32, i32) {
    %c0_i32 = arith.constant 0 : i32
    %c0_i32_0 = arith.constant 0 : i32
    %c0_i32_1 = arith.constant 0 : i32
    return %c0_i32, %c0_i32_0 : i32, i32
  }
  func.func @transform_5(%arg0: i32, %arg1: i32) -> (i32, i32) {
    %c0_i32 = arith.constant 0 : i32
    %c0_i32_0 = arith.constant 0 : i32
    %c0_i32_1 = arith.constant 0 : i32
    return %c0_i32, %c0_i32_0 : i32, i32
  }
  func.func @transform_6(%arg0: i32, %arg1: i32) -> (i32, i32) {
    %c0_i32 = arith.constant 0 : i32
    %c0_i32_0 = arith.constant 0 : i32
    %c0_i32_1 = arith.constant 0 : i32
    return %c0_i32, %c0_i32_0 : i32, i32
  }
  func.func @transform_7(%arg0: i32, %arg1: i32) -> (i32, i32) {
    %c0_i32 = arith.constant 0 : i32
    %c0_i32_0 = arith.constant 0 : i32
    %c0_i32_1 = arith.constant 0 : i32
    return %c0_i32, %c0_i32_0 : i32, i32
  }
  func.func @transform_8(%arg0: i32, %arg1: i32) -> (i32, i32) {
    %c0_i32 = arith.constant 0 : i32
    %c0_i32_0 = arith.constant 0 : i32
    %c0_i32_1 = arith.constant 0 : i32
    return %c0_i32, %c0_i32_0 : i32, i32
  }
  func.func @transform_9(%arg0: i32, %arg1: i32) -> (i32, i32) {
    %c0_i32 = arith.constant 0 : i32
    %c0_i32_0 = arith.constant 0 : i32
    %c0_i32_1 = arith.constant 0 : i32
    return %c0_i32, %c0_i32_0 : i32, i32
  }
  func.func @transform_10(%arg0: i32, %arg1: i32) -> (i32, i32) {
    %c0_i32 = arith.constant 0 : i32
    %c0_i32_0 = arith.constant 0 : i32
    %c0_i32_1 = arith.constant 0 : i32
    return %c0_i32, %c0_i32_0 : i32, i32
  }
  func.func @transform_11(%arg0: i32, %arg1: i32) -> (i32, i32) {
    %c0_i32 = arith.constant 0 : i32
    %c0_i32_0 = arith.constant 0 : i32
    %c0_i32_1 = arith.constant 0 : i32
    return %c0_i32, %c0_i32_0 : i32, i32
  }
  func.func @transform_12(%arg0: i32, %arg1: i32) -> (i32, i32) {
    %c0_i32 = arith.constant 0 : i32
    %c0_i32_0 = arith.constant 0 : i32
    %c0_i32_1 = arith.constant 0 : i32
    return %c0_i32, %c0_i32_0 : i32, i32
  }
  func.func @transform_13(%arg0: i32, %arg1: i32) -> (i32, i32) {
    %c0_i32 = arith.constant 0 : i32
    %c0_i32_0 = arith.constant 0 : i32
    %c0_i32_1 = arith.constant 0 : i32
    return %c0_i32, %c0_i32_0 : i32, i32
  }
  func.func @transform_14(%arg0: i32, %arg1: i32) -> (i32, i32, i32) {
    %c0_i32 = arith.constant 0 : i32
    %c0_i32_0 = arith.constant 0 : i32
    return %arg0, %arg1, %c0_i32 : i32, i32, i32
  }
}

</mosaic_0001>

<bundles_post_ra>
// kernel: tpu_custom_call.1
= control target key start
LH: loop header
LB: loop body
LE: loop exit
PB: predicated region body
PF: predicated region fallthrough
CT: control target
= control target key end

     0   :  { %s4136_s0 = inlined_call_operand.hbm [shape: f32[2,8,256], index: 0, kind: input, shape index: {}]   ;;  %s4137_s1 = inlined_call_operand.hbm [shape: f32[2,8,256], index: 1, kind: input, shape index: {}]   ;;  %s4138_s2 = inlined_call_operand.hbm [shape: f32[2,8,256], index: 2, kind: input, shape index: {}]   ;;  %s4139_s3 = inlined_call_operand.hbm [shape: bf16[256,256], index: 3, kind: input, shape index: {}]   ;;  %s4140_s4 = inlined_call_operand.hbm [shape: bf16[256,256], index: 4, kind: input, shape index: {}]   ;;  %s4141_s5 = inlined_call_operand.hbm [shape: bf16[256,256], index: 5, kind: input, shape index: {}]   ;;  %s4142_s6 = inlined_call_operand.hbm [shape: bf16[256,256], index: 6, kind: input, shape index: {}]   ;;  %s4143_s7 = inlined_call_operand.vmem [shape: f32[1,256], index: 7, kind: input, shape index: {}]   ;;  %s4144_s8 = inlined_call_operand.vmem [shape: f32[1,256], index: 8, kind: input, shape index: {}]   ;;  %s4145_s9 = inlined_call_operand.vmem [shape: f32[1,256], index: 9, kind: input, shape index: {}]   ;;  %s4146_s10 = inlined_call_operand.hbm [shape: bf16[256,256], index: 10, kind: input, shape index: {}]   ;;  %s4147_s11 = inlined_call_operand.vmem [shape: f32[1,256], index: 11, kind: input, shape index: {}]   ;;  %s4148_s12 = inlined_call_operand.hbm [shape: bf16[256,256], index: 12, kind: input, shape index: {}]   ;;  %s4149_s13 = inlined_call_operand.vmem [shape: f32[1,256], index: 13, kind: input, shape index: {}]   ;;  %s4150_s14 = inlined_call_operand.hbm [shape: f32[2,8,256], index: 14, kind: output, shape index: {}]  }
   0x1   :  { %4172 = sst [smem:[#allocation34_spill]] %s4137_s1 }
   0x2   :  { %4173 = sst [smem:[#allocation35_spill]] %s4139_s3 }
   0x3   :  { %4174 = sst [smem:[#allocation36_spill]] %s4140_s4 }
   0x4   :  { %4175 = sst [smem:[#allocation37_spill]] %s4141_s5 }
   0x5   :  { %4176 = sst [smem:[#allocation38_spill]] %s4146_s10 }
   0x6   :  { %4177 = sst [smem:[#allocation39_spill]] %s4147_s11 }
   0x7   :  { %4178 = sst [smem:[#allocation40_spill]] %s4149_s13 }
   0x8   :  { %4179 = sst [smem:[#allocation41_spill]] %s4150_s14 }
   0x9   :  { %19 = vsyncpa [#allocation5], 0 }
   0xa   :  { %21 = vsyncpa [#allocation5 + $0x1], 0 }
   0xb   :  { %22 = vsyncpa [#allocation8], 0 }
   0xc   :  { %24 = vsyncpa [#allocation8 + $0x1], 0 }
   0xd   :  { %25 = vsyncpa [#allocation11], 0 }
   0xe   :  { %26 = vsyncpa [#allocation14], 0 }
   0xf   :  { %27 = vsyncpa [#allocation17], 0 }
  0x10   :  { %28 = vsyncpa [#allocation6], 0 }
  0x11   :  { %30 = vsyncpa [#allocation6 + $0x1], 0  ;;  %s3739_s29 = smov 0   ;;  %s3741_s30 = smov 0  }
  0x12   :  { %s3743_s15 = smov 0   ;;  %s3745_s16 = smov 0  }
  0x13   :  { %s3747_s17 = smov 0   ;;  %s3749_s18 = smov 0  }
  0x14 LB: > { %4180 = sst [smem:[#allocation26_spill]] %s3629_s29  ;;  %s3770_s19 = sadd.s32 4294967295, %s3649_s18   ;;  %s3649_s18 = sphi %s3749_s18, %s36_s18   ;;  %s3645_s17 = sphi %s3747_s17, %s4228_s17   ;;  %s3641_s16 = sphi %s3745_s16, %s4227_s16   ;;  %s3637_s15 = sphi %s3743_s15, %s4231_s15   ;;  %s3633_s30 = sphi %s3741_s30, %s4230_s30   ;;  %s3629_s29 = sphi %s3739_s29, %s4229_s29  }
  0x15   : > { %4181 = sst [smem:[#allocation27_spill]] %s3641_s16  ;;  %p2626_p0 = scmp.ge.s32.totalorder %s3649_s18, 1 }
  0x16   : > { %4182 = sst [smem:[#allocation28_spill]] %s3645_s17  ;;  %p4165_p1 = scmp.eq.s32.totalorder %s3770_s19, 0 }
  0x17   : > { %4183 = sst [smem:[#allocation29_spill]] %s3649_s18  ;;  %p392_p2 = scmp.lt.s32.totalorder %s3649_s18, 3 }
  0x18   : > { %s3651_s21 = smov [#allocation10]   ;;  %s3652_s24 = smov [#allocation13]  }
  0x19   : > { %p3775_p3 = pnand %p2626_p0, %p392_p2  ;;  %s404_s22 = sshll.u32 %s3651_s21, 4  ;;  %s405_s22 = int_to_ptr.vmem [resolvable:$true] %s404_s22 }
  0x1a   : > { %s430_s25 = sshll.u32 %s3652_s24, 4  ;;  %s3653_s26 = smov [#allocation16]   ;;  %s431_s25 = int_to_ptr.vmem [resolvable:$true] %s430_s25 }
  0x1b   : > { %s4184_s20 = scalar_select %p3775_p3, 1, 0 }
  0x1c   : > { %p2901_p4 = pneg %p3775_p3  ;;  %s465_s27 = sshll.u32 %s3653_s26, 4  ;;  %s466_s27 = int_to_ptr.vmem [resolvable:$true] %s465_s27 }
  0x1d   : > { %s3324_s21 = scalar_lea.vmem %s405_s22, 4096  ;;  %p3332_p11 = scmp.lt.s32.totalorder %s405_s22, %s405_s22 }
  0x1e   : > { %p3784_p6 = pnand %p2901_p4, %p4165_p1  ;;  %p3325_p8 = scmp.ne.s32.totalorder %s405_s22, %s3324_s21 }
  0x1f   : > { %p3333_p12 = scmp.lt.s32.totalorder %s3324_s21, %s3324_s21 }
  0x20   : > { %s4185_s23 = scalar_select %p3784_p6, 1, 0 }
  0x21   : > { %p3790_p7 = pneg %p3784_p6  ;;  %p3334_p13 = por %p3333_p12, %p3332_p11 }
  0x23   : > { %p3327_p9 = pnand %p3325_p8, %p3790_p7 }
  0x25   : > { %p3328_p10 = pneg %p3327_p9 }
  0x27   : > { %p3335_p0 = pnand %p3334_p13, %p3328_p10 }
  0x29   : > { %3338 = shalt.err (!%p3335_p0)
}
  0x2a   : > { %s4152_s24 = smov 128   ;;  %s4154_s26 = smov 8  }
  0x2b   : > { %s4187_s3 = sld [smem:[#allocation35_spill]]  ;;  %s3350_s16 = scalar_lea.vmem %s431_s25, 4096 }
  0x2c   : > { %p3351_p2 = scmp.ne.s32.totalorder %s431_s25, %s3350_s16  ;;  %p3358_p9 = scmp.lt.s32.totalorder %s431_s25, %s431_s25 }
  0x2d   : > { %p3359_p10 = scmp.lt.s32.totalorder %s3350_s16, %s3350_s16 }
  0x2e   : > { %p3353_p4 = pnand %p3351_p2, %p3790_p7 }
  0x2f   : > { %p3360_p11 = por %p3359_p10, %p3358_p9 }
  0x30   : > { %p3354_p8 = pneg %p3353_p4 }
  0x31   : > { %2904 = dma.hbm_to_vmem [thread:$0]  (!%p3784_p6), %s4187_s3, 4096, %s405_s22, [#allocation11], %s4152_s24, %s4152_s24, %s4154_s26  }
  0x32   : > { %p3361_p12 = pnand %p3360_p11, %p3354_p8 }
  0x34   : > { %3364 = shalt.err (!%p3361_p12)
}
  0x35   : > { %s4188_s5 = sld [smem:[#allocation37_spill]]  ;;  %s3376_s13 = scalar_lea.vmem %s466_s27, 4096 }
  0x36   : > { %p3377_p13 = scmp.ne.s32.totalorder %s466_s27, %s3376_s13  ;;  %p3384_p4 = scmp.lt.s32.totalorder %s466_s27, %s466_s27 }
  0x37   : > { %p3385_p9 = scmp.lt.s32.totalorder %s3376_s13, %s3376_s13 }
  0x38   : > { %p3379_p0 = pnand %p3377_p13, %p3790_p7 }
  0x39   : > { %p3386_p8 = por %p3385_p9, %p3384_p4 }
  0x3a   : > { %p3380_p2 = pneg %p3379_p0 }
  0x3b   : > { %2910 = dma.hbm_to_vmem [thread:$0]  (!%p3784_p6), %s4188_s5, 4096, %s431_s25, [#allocation14], %s4152_s24, %s4152_s24, %s4154_s26  }
  0x3c   : > { %p3387_p10 = pnand %p3386_p8, %p3380_p2 }
  0x3e   : > { %3390 = shalt.err (!%p3387_p10)
}
  0x3f   : > { %s4189_s10 = sld [smem:[#allocation38_spill]]  ;;  %s2625_s16 = sadd.s32 4294967294, %s3649_s18  }
  0x40   : > { %s48_s22 = sadd.s32 1, %s3645_s17  ;;  %s57_s25 = sadd.s32 1, %s3637_s15 }
  0x41   : > { %p50_p11 = scmp.ge.s32.totalorder %s48_s22, 2  ;;  %p64_p12 = scmp.ne.s32.totalorder %s3637_s15, %s3633_s30 }
  0x42   : > { %p65_p13 = scmp.eq.s32.totalorder %s3649_s18, 0  ;;  %p70_p0 = scmp.ne.s32.totalorder %s3633_s30, %s3629_s29 }
  0x43   : > { %s4233_s22 = smov (%p50_p11, %s48_s22), 0  ;;  %p379_p9 = scmp.eq.s32.totalorder %s3770_s19, 1 }
  0x44   : > { %4190 = sst [smem:[#allocation30_spill]] %s4233_s22  ;;  %p3834_p2 = por %p65_p13, %p64_p12 }
  0x45   : > { %2916 = dma.hbm_to_vmem [thread:$0]  (!%p3784_p6), %s4189_s10, 4096, %s466_s27, [#allocation17], %s4152_s24, %s4152_s24, %s4154_s26  }
  0x46   : > { %p3840_p4 = por %p4165_p1, %p70_p0  ;;  %s52_s13 = ssub.s32 %s3645_s17, %s4233_s22 }
  0x47   : > { %p55_p8 = scmp.eq.s32.totalorder %s52_s13, 0  ;;  %p385_p10 = scmp.eq.s32.totalorder %s2625_s16, 1 }
  0x48   : > { %s4192_s27 = scalar_select %p3840_p4, 1, 0 }
  0x49   : > { %p3847_p5 = por %p379_p9, %p64_p12  ;;  %p2940_p11 = scmp.lt.s32.totalorder %s3649_s18, 2 }
  0x4a   : > { %s3853_s11 = scalar_select %p55_p8, %s3637_s15, %s57_s25  }
  0x4b   : > { %s4193_s14 = scalar_select %p3847_p5, 1, 0 }
  0x4c   : > { %4195 = sst [smem:[#allocation32_spill]] %s3853_s11  ;;  %p3855_p13 = por %p385_p10, %p70_p0 }
  0x4d   : > { %4194 = sst [smem:[#allocation31_spill]] %s4193_s14  ;;  %s4158_s26 = sand.u32 1, %s3637_s15  }
  0x4e   : > { %s4196_s24 = scalar_select %p3855_p13, 1, 0 }
  0x4f   : > { %s3862_s3 = sshll.u32 %s4158_s26, 4  ;;  %s3865_s5 = sshll.u32 %s3645_s17, 8 }
  0x50   : > { %4197 = sst [smem:[#allocation33_spill]] %s4196_s24  ;;  %p3869_p12 = pnand %p2940_p11, %p3834_p2 }
  0x51   : > { %s519_s25 = sand.u32 1, %s3649_s18   ;;  %s4199_s1 = sld [smem:[#allocation34_spill]] }
  0x52   : > { %s523_s11 = scalar_lea.vmem [#allocation7], %s3862_s3  ;;  %s3656_s26 = smov [#allocation12]  }
  0x53   : > { %s531_s24 = sshll.u32 %s523_s11, 4  ;;  %s417_s29 = sshll.u32 %s3656_s26, 4  ;;  %s532_s24 = int_to_ptr.vmem [resolvable:$true] %s531_s24  ;;  %s418_s29 = int_to_ptr.vmem [resolvable:$true] %s417_s29 }
  0x54   : > { %s3879_s17 = scalar_lea.sflag [#allocation8], %s519_s25  ;;  %p4167_p0 = pneg %p3869_p12 }
  0x55   : > { %s3404_s21 = scalar_lea.vmem %s532_s24, 256  ;;  %s3657_s18 = smov [#allocation7]  }
  0x56   : > { %p3405_p2 = scmp.ne.s32.totalorder %s532_s24, %s3404_s21  ;;  %s3409_s14 = sshll.u32 %s3657_s18, 4  ;;  %s3410_s14 = int_to_ptr.vmem [resolvable:$false] %s3409_s14 }
  0x57   : > { %s529_s22 = scalar_lea.hbm %s4199_s1, %s3865_s5  ;;  %s3411_s10 = scalar_lea.vmem %s3410_s14, 512 }
  0x58   : > { %p3407_p9 = pnand %p3405_p2, %p4167_p0  ;;  %p3412_p10 = scmp.lt.s32.totalorder %s532_s24, %s3410_s14 }
  0x59   : > { %p3413_p11 = scmp.lt.s32.totalorder %s3411_s10, %s3404_s21 }
  0x5a   : > { %p3408_p8 = pneg %p3407_p9 }
  0x5b   : > { %p3414_p1 = por %p3413_p11, %p3412_p10 }
  0x5d   : > { %p3415_p13 = pnand %p3414_p1, %p3408_p8 }
  0x5f   : > { %3418 = shalt.err (!%p3415_p13)
}
  0x60   : > { %2926 = dma.hbm_to_vmem [thread:$0]  (!%p3869_p12), %s529_s22, 256, %s532_s24, %s3879_s17  }
  0x61   : > { %s3430_s26 = scalar_lea.vmem %s418_s29, 4096  ;;  %p3438_p0 = scmp.lt.s32.totalorder %s418_s29, %s418_s29 }
  0x62   : > { %p3431_p5 = scmp.ne.s32.totalorder %s418_s29, %s3430_s26  ;;  %p3439_p4 = scmp.lt.s32.totalorder %s3430_s26, %s3430_s26 }
  0x64   : > { %p3433_p2 = pnand %p3431_p5, %p3790_p7  ;;  %p3440_p3 = por %p3439_p4, %p3438_p0 }
  0x66   : > { %p3434_p9 = pneg %p3433_p2 }
  0x68   : > { %p3441_p6 = pnand %p3440_p3, %p3434_p9 }
  0x6a   : > { %3444 = shalt.err (!%p3441_p6)
}
  0x6b   : > { %p4200_p10 = scmp.ne.s32.totalorder %s4185_s23, 0  ;;  %s4201_s18 = smov 8  }
  0x6c   : > { %s4202_s14 = smov 128   ;;  %s4203_s4 = sld [smem:[#allocation36_spill]] }
  0x6d   : > { %s3658_s24 = smov [#allocation15]   ;;  %s3659_s13 = smov [#allocation18]  }
  0x6e   : > { %s443_s22 = sshll.u32 %s3658_s24, 4  ;;  %s481_s21 = sshll.u32 %s3659_s13, 4  ;;  %s444_s22 = int_to_ptr.vmem [resolvable:$true] %s443_s22  ;;  %s482_s21 = int_to_ptr.vmem [resolvable:$true] %s481_s21 }
  0x6f   : > { %s3456_s10 = scalar_lea.vmem %s444_s22, 4096  ;;  %p3464_p6 = scmp.lt.s32.totalorder %s444_s22, %s444_s22 }
  0x70   : > { %p3457_p1 = scmp.ne.s32.totalorder %s444_s22, %s3456_s10  ;;  %p3465_p4 = scmp.lt.s32.totalorder %s3456_s10, %s3456_s10 }
  0x72   : > { %2907 = dma.hbm_to_vmem [thread:$0]  (!%p4200_p10), %s4203_s4, 4096, %s418_s29, [#allocation11], %s4202_s14, %s4202_s14, %s4201_s18  }
  0x73   : > { %p3459_p3 = pnand %p3457_p1, %p3790_p7  ;;  %p3466_p13 = por %p3465_p4, %p3464_p6 }
  0x75   : > { %p3460_p5 = pneg %p3459_p3 }
  0x77   : > { %p3467_p0 = pnand %p3466_p13, %p3460_p5 }
  0x79   : > { %3470 = shalt.err (!%p3467_p0)
}
  0x7a   : > { %2913 = dma.hbm_to_vmem [thread:$0]  (!%p4200_p10), %s4142_s6, 4096, %s444_s22, [#allocation14], %s4202_s14, %s4202_s14, %s4201_s18  }
  0x7b   : > { %s3482_s11 = scalar_lea.vmem %s482_s21, 4096  ;;  %p3490_p9 = scmp.lt.s32.totalorder %s482_s21, %s482_s21 }
  0x7c   : > { %p3483_p8 = scmp.ne.s32.totalorder %s482_s21, %s3482_s11  ;;  %p3491_p1 = scmp.lt.s32.totalorder %s3482_s11, %s3482_s11 }
  0x7e   : > { %p3485_p11 = pnand %p3483_p8, %p3790_p7  ;;  %p3492_p3 = por %p3491_p1, %p3490_p9 }
  0x80   : > { %p3486_p2 = pneg %p3485_p11 }
  0x82   : > { %p3493_p5 = pnand %p3492_p3, %p3486_p2 }
  0x84   : > { %3496 = shalt.err (!%p3493_p5)
}
  0x85   : > { %2919 = dma.hbm_to_vmem [thread:$0]  (!%p4200_p10), %s4148_s12, 4096, %s482_s21, [#allocation17], %s4202_s14, %s4202_s14, %s4201_s18  }
  0x86   : > { %s510_s13 = scalar_lea.hbm %s4136_s0, %s3865_s5  ;;  %s502_s10 = scalar_lea.vmem [#allocation4], %s3862_s3 }
  0x87   : > { %s512_s29 = sshll.u32 %s502_s10, 4  ;;  %s548_s11 = scalar_lea.hbm %s4138_s2, %s3865_s5  ;;  %s513_s29 = int_to_ptr.vmem [resolvable:$true] %s512_s29 }
  0x88   : > { %s4204_s1 = sand.u32 1, %s3637_s15   ;;  %s3510_s25 = scalar_lea.vmem %s513_s29, 256 }
  0x89   : > { %s499_s4 = scalar_lea.sflag [#allocation5], %s4204_s1  ;;  %p3511_p7 = scmp.ne.s32.totalorder %s513_s29, %s3510_s25 }
  0x8a   : > { %p4205_p6 = pneg %p3869_p12  ;;  %s3660_s18 = smov [#allocation4]  }
  0x8b   : > { %s3515_s14 = sshll.u32 %s3660_s18, 4  ;;  %s3516_s14 = int_to_ptr.vmem [resolvable:$false] %s3515_s14 }
  0x8c   : > { %p3513_p4 = pnand %p3511_p7, %p4205_p6  ;;  %s3517_s21 = scalar_lea.vmem %s3516_s14, 512 }
  0x8d   : > { %p3518_p10 = scmp.lt.s32.totalorder %s513_s29, %s3516_s14  ;;  %p3519_p0 = scmp.lt.s32.totalorder %s3517_s21, %s3510_s25 }
  0x8e   : > { %p3514_p13 = pneg %p3513_p4 }
  0x8f   : > { %p3520_p8 = por %p3519_p0, %p3518_p10 }
  0x91   : > { %p3521_p11 = pnand %p3520_p8, %p3514_p13 }
  0x93   : > { %3524 = shalt.err (!%p3521_p11)
}
  0x94   : > { %2923 = dma.hbm_to_vmem [thread:$0]  (!%p3869_p12), %s510_s13, 256, %s513_s29, %s499_s4  }
  0x95   : > { %s542_s1 = scalar_lea.vmem [#allocation9], %s3862_s3  ;;  %p4206_p9 = pmov %p4205_p6 }
  0x96   : > { %s550_s24 = sshll.u32 %s542_s1, 4  ;;  %s3661_s22 = smov [#allocation9]   ;;  %s551_s24 = int_to_ptr.vmem [resolvable:$true] %s550_s24 }
  0x97   : > { %s3538_s28 = scalar_lea.vmem %s551_s24, 256  ;;  %s3543_s10 = sshll.u32 %s3661_s22, 4  ;;  %s3544_s10 = int_to_ptr.vmem [resolvable:$false] %s3543_s10 }
  0x98   : > { %p3539_p2 = scmp.ne.s32.totalorder %s551_s24, %s3538_s28  ;;  %s3545_s23 = scalar_lea.vmem %s3544_s10, 512 }
  0x99   : > { %p3546_p5 = scmp.lt.s32.totalorder %s551_s24, %s3544_s10  ;;  %p3547_p7 = scmp.lt.s32.totalorder %s3545_s23, %s3538_s28 }
  0x9a   : > { %p3541_p1 = pnand %p3539_p2, %p4206_p9 }
  0x9b   : > { %p3548_p6 = por %p3547_p7, %p3546_p5 }
  0x9c   : > { %p3542_p3 = pneg %p3541_p1 }
  0x9e   : > { %p3549_p4 = pnand %p3548_p6, %p3542_p3 }
  0xa0   : > { %3552 = shalt.err (!%p3549_p4)
}
  0xa1   : > { %2929 = dma.hbm_to_vmem [thread:$0]  (!%p3869_p12), %s548_s11, 256, %s551_s24, %s3879_s17  }
  0xa2   : > { %p4207_p13 = scmp.ne.s32.totalorder %s4184_s20, 0 }
  0xa3   : > { %s3950_s13 = sand.u32 (!%p4207_p13), 1, %s3633_s30   ;;  %p4208_p10 = scmp.ne.s32.totalorder (!%p4207_p13), %s4192_s27, 0 }
  0xa4   : > { %559 = sbr.rel (%p4207_p13) target bundleno = 2129 (0x851), region = 76  ;;  %s3953_s29 = sshll.u32 (!%p4207_p13), %s3950_s13, 4 }
  0xa5   : > { %s562_s16 = scalar_lea.sflag (!%p4207_p13), [#allocation5], %s3950_s13  ;;  %s3957_s26 = scalar_lea.vmem (!%p4207_p13), [#allocation4], %s3953_s29 }
  0xa9   : > { %3604 = dma.done.wait (%p4208_p10), %s562_s16, 256  }
  0xaa   : > { %3606 = vsyncadd (%p4208_p10), %s562_s16, 4294967040  ;;  %s570_s5 = sand.u32 1, %s3770_s19   ;;  %s574_s20 = scalar_lea.vmem [#allocation7], %s3953_s29 }
  0xab   : > { %s571_s17 = scalar_lea.sflag [#allocation8], %s570_s5 }
  0xac   : > { %3608 = dma.done.wait (%p4208_p10), %s571_s17, 512  }
  0xad   : > { %3610 = vsyncadd (%p4208_p10), %s571_s17, 4294966784  ;;  %s583_s11 = scalar_lea.vmem [#allocation9], %s3953_s29  ;;  %p4209_p12 = scmp.eq.s32.totalorder %s3770_s19, 0 }
  0xaf   : > { %3612 = dma.done.wait (%p4209_p12), [#allocation11], 8192   ;;  %p4210_p0 = pmov %p4209_p12 }
  0xb1   : > { %3614 = vsyncadd (%p4210_p0), [#allocation11], 4294959104  ;;  %p4211_p8 = pmov %p4210_p0 }
  0xb2   : > { %p4212_p11 = pmov %p4210_p0 }
  0xb3   : > { %3616 = dma.done.wait (%p4211_p8), [#allocation14], 8192  }
  0xb4   : > { %3618 = vsyncadd (%p4212_p11), [#allocation14], 4294959104  ;;  %p4213_p2 = pmov %p4210_p0 }
  0xb5   : > { %p4214_p9 = pmov %p4210_p0 }
  0xb6   : > { %3620 = dma.done.wait (%p4213_p2), [#allocation17], 8192  }
  0xb7   : > { %3622 = vsyncadd (%p4214_p9), [#allocation17], 4294959104  ;;  %v669_v0 = vld [vmem:[%s574_s20] sm:$0xff]  ;;  %v670_v1 = vld [vmem:[%s574_s20 + $0x8] sm:$0xff]  ;;  %v689_v61 = vlaneseq  ;;  %vm1576_vm0 = vcmask 1043456   ;;  %vm1554_vm1 = vcmask 64512  }
  0xb8   : > { %v1224_v2 = vld [vmem:[%s3957_s26] sm:$0xff]  ;;  %v671_v3 = vadd.f32 %v670_v1, %v669_v0  ;;  %v1225_v4 = vld [vmem:[%s3957_s26 + $0x8] sm:$0xff]  ;;  %s4215_s28 = sld [smem:[#allocation39_spill]]  ;;  %s2424_s27 = scalar_lea.sflag [#allocation6], %s3950_s13 }
  0xb9   : > { %v1226_v5 = vadd.f32 %v1225_v4, %v1224_v2  ;;  %v3005_v6 = vld [vmem:[#allocation12 + $0x74] ss:$8 sps:$4 sm:$0xff]   ;;  %v3007_v7 = vld [vmem:[#allocation12 + $0x70] ss:$8 sps:$4 sm:$0xff]   ;;  %v3008_v8 = vld [vmem:[#allocation12 + $0x64] ss:$8 sps:$4 sm:$0xff]  }
  0xba   : > { %672 = vadd.xlane.f32.xlu0 %v671_v3  ;;  %932 = vmatprep.subr.bf16.mxu0 %v3005_v6  ;;  %v3010_v9 = vld [vmem:[#allocation12 + $0x60] ss:$8 sps:$4 sm:$0xff]   ;;  %v3011_v10 = vld [vmem:[#allocation12 + $0x54] ss:$8 sps:$4 sm:$0xff]   ;;  %v3013_v11 = vld [vmem:[#allocation12 + $0x50] ss:$8 sps:$4 sm:$0xff]  }
  0xbb   : > { %933 = vmatpush1.bf16.msra.mxu0 %v3007_v7  ;;  %v3014_v12 = vld [vmem:[#allocation12 + $0x44] ss:$8 sps:$4 sm:$0xff]   ;;  %v3016_v13 = vld [vmem:[#allocation12 + $0x40] ss:$8 sps:$4 sm:$0xff]   ;;  %v3017_v14 = vld [vmem:[#allocation12 + $0x34] ss:$8 sps:$4 sm:$0xff]  }
  0xbc   : > { %934 = vmatprep.subr.bf16.mxu0 %v3008_v8  ;;  %v3019_v15 = vld [vmem:[#allocation12 + $0x30] ss:$8 sps:$4 sm:$0xff]   ;;  %v3020_v16 = vld [vmem:[#allocation12 + $0x24] ss:$8 sps:$4 sm:$0xff]   ;;  %v3022_v17 = vld [vmem:[#allocation12 + $0x20] ss:$8 sps:$4 sm:$0xff]  }
  0xbd   : > { %v3023_v18 = vld [vmem:[#allocation12 + $0x14] ss:$8 sps:$4 sm:$0xff]   ;;  %v3025_v19 = vld [vmem:[#allocation12 + $0x10] ss:$8 sps:$4 sm:$0xff]   ;;  %v3026_v20 = vld [vmem:[#allocation12 + $0x4] ss:$8 sps:$4 sm:$0xff]  }
  0xbe   : > { %1227 = vadd.xlane.f32.xlu0 %v1226_v5  ;;  %v3028_v21 = vld [vmem:[#allocation12] ss:$8 sps:$4 sm:$0xff]   ;;  %v3029_v22 = vld [vmem:[#allocation12 + $0xf4] ss:$8 sps:$4 sm:$0xff]   ;;  %v3031_v23 = vld [vmem:[#allocation12 + $0xf0] ss:$8 sps:$4 sm:$0xff]  }
  0xbf   : > { %935 = vmatpush1.bf16.msra.mxu0 %v3010_v9  ;;  %v3032_v24 = vld [vmem:[#allocation12 + $0xe4] ss:$8 sps:$4 sm:$0xff]   ;;  %v3034_v25 = vld [vmem:[#allocation12 + $0xe0] ss:$8 sps:$4 sm:$0xff]   ;;  %v3035_v40 = vld [vmem:[#allocation12 + $0xd4] ss:$8 sps:$4 sm:$0xff]  }
  0xc0   : > { %936 = vmatprep.subr.bf16.mxu0 %v3011_v10  ;;  %v3037_v41 = vld [vmem:[#allocation12 + $0xd0] ss:$8 sps:$4 sm:$0xff]   ;;  %v3038_v42 = vld [vmem:[#allocation12 + $0xc4] ss:$8 sps:$4 sm:$0xff]   ;;  %v3040_v43 = vld [vmem:[#allocation12 + $0xc0] ss:$8 sps:$4 sm:$0xff]  }
  0xc1   : > { %v3041_v44 = vld [vmem:[#allocation12 + $0xb4] ss:$8 sps:$4 sm:$0xff]   ;;  %v3043_v45 = vld [vmem:[#allocation12 + $0xb0] ss:$8 sps:$4 sm:$0xff]   ;;  %v3044_v46 = vld [vmem:[#allocation12 + $0xa4] ss:$8 sps:$4 sm:$0xff]  }
  0xc2   : > { %v3046_v47 = vld [vmem:[#allocation12 + $0xa0] ss:$8 sps:$4 sm:$0xff]   ;;  %v3047_v48 = vld [vmem:[#allocation12 + $0x94] ss:$8 sps:$4 sm:$0xff]   ;;  %v3049_v49 = vld [vmem:[#allocation12 + $0x90] ss:$8 sps:$4 sm:$0xff]  }
  0xc3   : > { %937 = vmatpush1.bf16.msra.mxu0 %v3013_v11  ;;  %v3050_v50 = vld [vmem:[#allocation12 + $0x84] ss:$8 sps:$4 sm:$0xff]   ;;  %v3052_v51 = vld [vmem:[#allocation12 + $0x80] ss:$8 sps:$4 sm:$0xff]   ;;  %v3055_v52 = vld [vmem:[#allocation10 + $0x74] ss:$8 sps:$4 sm:$0xff]  }
  0xc4   : > { %938 = vmatprep.subr.bf16.mxu0 %v3014_v12  ;;  %v3998_v53 = vld [vmem:[%s583_s11] sm:$0xff]  ;;  %v4002_v54 = vld [vmem:[%s583_s11 + $0x8] sm:$0xff]  ;;  %v690_v63 = vshrl.u32 %v689_v61, 7  ;;  %s4216_s22 = sld [smem:[#allocation27_spill]] }
  0xc5   : > { %v718_v55 = vadd.f32 %v4002_v54, %v3998_v53  ;;  %v664_v3 = vld [vmem:[%s4145_s9] sm:$0x3]  ;;  %s4217_s3 = sld [smem:[#allocation40_spill]] }
  0xc6   : > { %s4218_s4 = sld [smem:[#allocation31_spill]] }
  0xc7   : > { %939 = vmatpush1.bf16.msra.mxu0 %v3016_v13  ;;  %719 = vadd.xlane.f32.xlu0 %v718_v55  ;;  %v3100_v55 = vld [vmem:[#allocation10 + $0x84] ss:$8 sps:$4 sm:$0xff]   ;;  %s4219_s11 = sld [smem:[#allocation41_spill]] }
  0xc8   : > { %940 = vmatprep.subr.bf16.mxu0 %v3017_v14 }
  0xca   : > { %s2864_s16 = sshll.u32 %s4216_s22, 8 }
  0xcb   : > { %941 = vmatpush1.bf16.msra.mxu0 %v3019_v15 }
  0xcc   : > { %942 = vmatprep.subr.bf16.mxu0 %v3020_v16  ;;  %p4220_p3 = scmp.ne.s32.totalorder %s4218_s4, 0 }
  0xcd   : > { %s4094_s19 = scalar_lea.hbm %s4219_s11, %s2864_s16 }
  0xcf   : > { %943 = vmatpush1.bf16.msra.mxu0 %v3022_v17 }
  0xd0   : > { %944 = vmatprep.subr.bf16.mxu0 %v3023_v18  ;;  %v3053_v18 = vld [vmem:[#allocation10 + $0x70] ss:$8 sps:$4 sm:$0xff]  }
  0xd3   : > { %945 = vmatpush1.bf16.msra.mxu0 %v3025_v19 }
  0xd4   : > { %946 = vmatprep.subr.bf16.mxu0 %v3026_v20 }
  0xd7   : > { %947 = vmatpush1.bf16.msra.mxu0 %v3028_v21  ;;  %v3058_v21 = vld [vmem:[#allocation10 + $0x64] ss:$8 sps:$4 sm:$0xff]  }
  0xd8   : > { %948 = vmatprep.subr.bf16.mxu0 %v3029_v22 }
  0xdb   : > { %949 = vmatpush2.bf16.msra.mxu0 %v3031_v23  ;;  %v3056_v23 = vld [vmem:[#allocation10 + $0x60] ss:$8 sps:$4 sm:$0xff]  }
  0xdc   : > { %950 = vmatprep.subr.bf16.mxu0 %v3032_v24 }
  0xdf   : > { %951 = vmatpush2.bf16.msra.mxu0 %v3034_v25  ;;  %v3061_v25 = vld [vmem:[#allocation10 + $0x54] ss:$8 sps:$4 sm:$0xff]  }
  0xe0   : > { %952 = vmatprep.subr.bf16.mxu0 %v3035_v40  ;;  %v3082_v40 = vld [vmem:[#allocation10 + $0xe4] ss:$8 sps:$4 sm:$0xff]  }
  0xe3   : > { %953 = vmatpush2.bf16.msra.mxu0 %v3037_v41  ;;  %v3080_v41 = vld [vmem:[#allocation10 + $0xe0] ss:$8 sps:$4 sm:$0xff]  }
  0xe4   : > { %954 = vmatprep.subr.bf16.mxu0 %v3038_v42  ;;  %v3085_v42 = vld [vmem:[#allocation10 + $0xd4] ss:$8 sps:$4 sm:$0xff]  }
  0xe7   : > { %955 = vmatpush2.bf16.msra.mxu0 %v3040_v43  ;;  %v3083_v43 = vld [vmem:[#allocation10 + $0xd0] ss:$8 sps:$4 sm:$0xff]  }
  0xe8   : > { %956 = vmatprep.subr.bf16.mxu0 %v3041_v44  ;;  %v3088_v44 = vld [vmem:[#allocation10 + $0xc4] ss:$8 sps:$4 sm:$0xff]  }
  0xeb   : > { %957 = vmatpush2.bf16.msra.mxu0 %v3043_v45  ;;  %v3086_v45 = vld [vmem:[#allocation10 + $0xc0] ss:$8 sps:$4 sm:$0xff]  }
  0xec   : > { %958 = vmatprep.subr.bf16.mxu0 %v3044_v46  ;;  %v3091_v46 = vld [vmem:[#allocation10 + $0xb4] ss:$8 sps:$4 sm:$0xff]  }
  0xef   : > { %959 = vmatpush2.bf16.msra.mxu0 %v3046_v47  ;;  %v3089_v47 = vld [vmem:[#allocation10 + $0xb0] ss:$8 sps:$4 sm:$0xff]  }
  0xf0   : > { %960 = vmatprep.subr.bf16.mxu0 %v3047_v48  ;;  %v3094_v48 = vld [vmem:[#allocation10 + $0xa4] ss:$8 sps:$4 sm:$0xff]  }
  0xf3   : > { %961 = vmatpush2.bf16.msra.mxu0 %v3049_v49  ;;  %v3092_v49 = vld [vmem:[#allocation10 + $0xa0] ss:$8 sps:$4 sm:$0xff]  }
  0xf4   : > { %962 = vmatprep.subr.bf16.mxu0 %v3050_v50  ;;  %v3097_v50 = vld [vmem:[#allocation10 + $0x94] ss:$8 sps:$4 sm:$0xff]  }
  0xf7   : > { %963 = vmatpush2.bf16.msra.mxu0 %v3052_v51 }
  0xf8   : > { %1463 = vmatprep.subr.bf16.mxu0 %v3055_v52  ;;  %v3095_v52 = vld [vmem:[#allocation10 + $0x90] ss:$8 sps:$4 sm:$0xff]  }
 0x143   : > { %v673_v26 = vpop.xlane.xlu0 %672 }
 0x144   : > { %v675_v27 = vmul.f32 0.00390625, %v673_v26  ;;  %v3059_v26 = vld [vmem:[#allocation10 + $0x50] ss:$8 sps:$4 sm:$0xff]  }
 0x146   : > { %v3984_v28 = vsub.f32 %v669_v0, %v675_v27  ;;  %v677_v29 = vsub.f32 %v670_v1, %v675_v27  ;;  %v4006_v0 = vsub.s32 0, %v690_v63  ;;  %v4008_v1 = vsub.s32 1, %v690_v63  ;;  %v3064_v27 = vld [vmem:[#allocation10 + $0x44] ss:$8 sps:$4 sm:$0xff]  }
 0x147   : > { %v1228_v30 = vpop.xlane.xlu0 %1227 }
 0x148   : > { %v1230_v31 = vmul.f32 0.00390625, %v1228_v30  ;;  %v678_v32 = vmul.f32 %v3984_v28, %v3984_v28  ;;  %v679_v33 = vmul.f32 %v677_v29, %v677_v29  ;;  %v4023_v8 = vrot.slane %v664_v3, %v4006_v0  ;;  %v3065_v30 = vld [vmem:[#allocation10 + $0x30] ss:$8 sps:$4 sm:$0xff]  }
 0x149   : > { %v4026_v9 = vrot.slane %v664_v3, %v4008_v1 }
 0x14a   : > { %v3988_v34 = vsub.f32 %v1224_v2, %v1230_v31  ;;  %v3990_v35 = vsub.f32 %v1225_v4, %v1230_v31  ;;  %v680_v36 = vadd.f32 %v679_v33, %v678_v32  ;;  %v663_v2 = vld [vmem:[%s4144_s8] sm:$0x3]  ;;  %v3070_v31 = vld [vmem:[#allocation10 + $0x24] ss:$8 sps:$4 sm:$0xff]   ;;  %v3073_v33 = vld [vmem:[#allocation10 + $0x14] ss:$8 sps:$4 sm:$0xff]  }
 0x14b   : > { %v4017_v4 = vrot.slane %v663_v2, %v4006_v0  ;;  %v4020_v5 = vrot.slane %v663_v2, %v4008_v1  ;;  %v3068_v32 = vld [vmem:[#allocation10 + $0x20] ss:$8 sps:$4 sm:$0xff]  }
 0x14c   : > { %681 = vadd.xlane.f32.xlu1 %v680_v36  ;;  %v1233_v37 = vmul.f32 %v3988_v34, %v3988_v34  ;;  %v1234_v38 = vmul.f32 %v3990_v35, %v3990_v35  ;;  %v3076_v36 = vld [vmem:[#allocation10 + $0x4] ss:$8 sps:$4 sm:$0xff]  }
 0x14e   : > { %v1235_v39 = vadd.f32 %v1234_v38, %v1233_v37  ;;  %v3074_v37 = vld [vmem:[#allocation10] ss:$8 sps:$4 sm:$0xff]   ;;  %v3079_v38 = vld [vmem:[#allocation10 + $0xf4] ss:$8 sps:$4 sm:$0xff]  }
 0x150   : > { %1236 = vadd.xlane.f32.xlu1 %v1235_v39  ;;  %v3077_v39 = vld [vmem:[#allocation10 + $0xf0] ss:$8 sps:$4 sm:$0xff]  }
 0x1d5   : > { %v682_v56 = vpop.xlane.xlu1 %681 }
 0x1d6   : > { %v683_v57 = vmul.f32 0.00390625, %v682_v56 }
 0x1d8   : > { %v684_v58 = vadd.f32 1e-05, %v683_v57  ;;  %v3098_v57 = vld [vmem:[#allocation10 + $0x80] ss:$8 sps:$4 sm:$0xff]  }
 0x1d9   : > { %v1237_v59 = vpop.xlane.xlu1 %1236 }
 0x1da   : > { %3293 = vrsqrt.f32 %v684_v58  ;;  %v1238_v60 = vmul.f32 0.00390625, %v1237_v59 }
 0x1dc   : > { %v1239_v62 = vadd.f32 1e-05, %v1238_v60  ;;  %v720_v60 = vpop.xlane.xlu0 %719 }
 0x1dd   : > { %v721_v61 = vmul.f32 0.00390625, %v720_v60 }
 0x1de   : > { %3295 = vrsqrt.f32 %v1239_v62 }
 0x1df   : > { %v4044_v62 = vsub.f32 %v3998_v53, %v721_v61  ;;  %v3107_v53 = vld [vmem:[#allocation13 + $0x54] ss:$8 sps:$4 sm:$0xff]  }
 0x1e1   : > { %v724_v63 = vmul.f32 %v4044_v62, %v4044_v62 }
 0x1e7   : > { %v3294_v6 = vpop.eup %3293 }
 0x1e8   : > { %v687_v7 = vmul.f32 %v3294_v6, %v677_v29  ;;  %v686_v10 = vmul.f32 %v3294_v6, %v3984_v28  ;;  %v3062_v28 = vld [vmem:[#allocation10 + $0x40] ss:$8 sps:$4 sm:$0xff]   ;;  %v3067_v29 = vld [vmem:[#allocation10 + $0x34] ss:$8 sps:$4 sm:$0xff]  }
 0x1e9   : > { %v3101_v6 = vld [vmem:[#allocation13 + $0x74] ss:$8 sps:$4 sm:$0xff]  }
 0x1ea   : > { %v700_v11 = vmul.f32 %v4020_v5, %v687_v7  ;;  %v699_v12 = vmul.f32 %v4017_v4, %v686_v10  ;;  %v3103_v7 = vld [vmem:[#allocation13 + $0x70] ss:$8 sps:$4 sm:$0xff]   ;;  %v3104_v10 = vld [vmem:[#allocation13 + $0x64] ss:$8 sps:$4 sm:$0xff]   ;;  %1174 = vmatprep.subr.bf16.mxu1 %v3101_v6 }
 0x1eb   : > { %v4031_v13 = vpop.eup %3295  ;;  %1175 = vmatpush1.bf16.msra.mxu1 %v3103_v7 }
 0x1ec   : > { %v713_v14 = vadd.f32 %v4026_v9, %v700_v11  ;;  %v712_v15 = vadd.f32 %v4023_v8, %v699_v12  ;;  %v1242_v16 = vmul.f32 %v4031_v13, %v3990_v35  ;;  %v3071_v35 = vld [vmem:[#allocation10 + $0x10] ss:$8 sps:$4 sm:$0xff]   ;;  %v1241_v51 = vmul.f32 %v4031_v13, %v3988_v34  ;;  %v3106_v11 = vld [vmem:[#allocation13 + $0x60] ss:$8 sps:$4 sm:$0xff]   ;;  %1176 = vmatprep.subr.bf16.mxu1 %v3104_v10 }
 0x1ed   : > { %v4047_v34 = vsub.f32 %v4002_v54, %v721_v61  ;;  %v3109_v12 = vld [vmem:[#allocation13 + $0x50] ss:$8 sps:$4 sm:$0xff]   ;;  %v3110_v54 = vld [vmem:[#allocation13 + $0x44] ss:$8 sps:$4 sm:$0xff]   ;;  %v3112_v13 = vld [vmem:[#allocation13 + $0x40] ss:$8 sps:$4 sm:$0xff]  }
 0x1ee   : > { %v715_v17 = vpack.c.bf16 %v713_v14, %v713_v14  ;;  %v714_v19 = vpack.c.bf16 %v712_v15, %v712_v15  ;;  %v1255_v20 = vmul.f32 %v1242_v16, %v4020_v5  ;;  %v1254_v56 = vmul.f32 %v1241_v51, %v4017_v4  ;;  %v3113_v14 = vld [vmem:[#allocation13 + $0x34] ss:$8 sps:$4 sm:$0xff]   ;;  %v3115_v15 = vld [vmem:[#allocation13 + $0x30] ss:$8 sps:$4 sm:$0xff]   ;;  %v3116_v16 = vld [vmem:[#allocation13 + $0x24] ss:$8 sps:$4 sm:$0xff]  }
 0x1ef   : > { %v725_v2 = vmul.f32 %v4047_v34, %v4047_v34  ;;  %1177 = vmatpush1.bf16.msra.mxu1 %v3106_v11 }
 0x1f0   : > { %964 = vmatprep.mubr.bf16.mxu0 %v715_v17  ;;  %v1268_v22 = vadd.f32 %v1255_v20, %v4026_v9  ;;  %v1267_v58 = vadd.f32 %v1254_v56, %v4023_v8  ;;  %1178 = vmatprep.subr.bf16.mxu1 %v3107_v53  ;;  %v3118_v17 = vld [vmem:[#allocation13 + $0x20] ss:$8 sps:$4 sm:$0xff]   ;;  %v3122_v20 = vld [vmem:[#allocation13 + $0x4] ss:$8 sps:$4 sm:$0xff]  }
 0x1f1   : > { %965 = vmatmul.mubr.bf16.vlgmr.msra.gmra.mxu0 %v714_v19  ;;  %v726_v3 = vadd.f32 %v725_v2, %v724_v63  ;;  %v3121_v19 = vld [vmem:[#allocation13 + $0x10] ss:$8 sps:$4 sm:$0xff]  }
 0x1f2   : > { %1464 = vmatpush1.bf16.msra.mxu0 %v3053_v18  ;;  %v1270_v24 = vpack.c.bf16 %v1268_v22, %v1268_v22  ;;  %v1269_v59 = vpack.c.bf16 %v1267_v58, %v1267_v58  ;;  %v3119_v18 = vld [vmem:[#allocation13 + $0x14] ss:$8 sps:$4 sm:$0xff]  }
 0x1f3   : > { %1465 = vmatprep.subr.bf16.mxu0 %v3058_v21  ;;  %727 = vadd.xlane.f32.xlu1 %v726_v3  ;;  %v3124_v21 = vld [vmem:[#allocation13] ss:$8 sps:$4 sm:$0xff]   ;;  %v3125_v22 = vld [vmem:[#allocation13 + $0xf4] ss:$8 sps:$4 sm:$0xff]  }
 0x1f4   : > { %1495 = vmatprep.mubr.bf16.mxu0 %v1270_v24  ;;  %1179 = vmatpush1.bf16.msra.mxu1 %v3109_v12  ;;  %v3128_v24 = vld [vmem:[#allocation13 + $0xe4] ss:$8 sps:$4 sm:$0xff]  }
 0x1f5   : > { %1180 = vmatprep.subr.bf16.mxu1 %v3110_v54 }
 0x1f6   : > { %1466 = vmatpush1.bf16.msra.mxu0 %v3056_v23  ;;  %v3127_v23 = vld [vmem:[#allocation13 + $0xf0] ss:$8 sps:$4 sm:$0xff]  }
 0x1f7   : > { %1467 = vmatprep.subr.bf16.mxu0 %v3061_v25  ;;  %v3130_v25 = vld [vmem:[#allocation13 + $0xe0] ss:$8 sps:$4 sm:$0xff]  }
 0x1f8   : > { %1181 = vmatpush1.bf16.msra.mxu1 %v3112_v13 }
 0x1f9   : > { %1182 = vmatprep.subr.bf16.mxu1 %v3113_v14 }
 0x1fa   : > { %1468 = vmatpush1.bf16.msra.mxu0 %v3059_v26  ;;  %v3131_v26 = vld [vmem:[#allocation13 + $0xd4] ss:$8 sps:$4 sm:$0xff]  }
 0x1fb   : > { %1469 = vmatprep.subr.bf16.mxu0 %v3064_v27  ;;  %v3133_v27 = vld [vmem:[#allocation13 + $0xd0] ss:$8 sps:$4 sm:$0xff]  }
 0x1fc   : > { %1183 = vmatpush1.bf16.msra.mxu1 %v3115_v15 }
 0x1fd   : > { %1184 = vmatprep.subr.bf16.mxu1 %v3116_v16 }
 0x1fe   : > { %1470 = vmatpush1.bf16.msra.mxu0 %v3062_v28  ;;  %v3134_v28 = vld [vmem:[#allocation13 + $0xc4] ss:$8 sps:$4 sm:$0xff]  }
 0x1ff   : > { %1471 = vmatprep.subr.bf16.mxu0 %v3067_v29  ;;  %v3136_v29 = vld [vmem:[#allocation13 + $0xc0] ss:$8 sps:$4 sm:$0xff]  }
 0x200   : > { %1185 = vmatpush1.bf16.msra.mxu1 %v3118_v17  ;;  %v3662_v17 = vmov 0  }
 0x201   : > { %1186 = vmatprep.subr.bf16.mxu1 %v3119_v18  ;;  %v3151_v18 = vld [vmem:[#allocation15 + $0x74] ss:$8 sps:$4 sm:$0xff]  }
 0x202   : > { %1472 = vmatpush1.bf16.msra.mxu0 %v3065_v30  ;;  %v3137_v30 = vld [vmem:[#allocation13 + $0xb4] ss:$8 sps:$4 sm:$0xff]  }
 0x203   : > { %1473 = vmatprep.subr.bf16.mxu0 %v3070_v31  ;;  %v3139_v31 = vld [vmem:[#allocation13 + $0xb0] ss:$8 sps:$4 sm:$0xff]  }
 0x204   : > { %1187 = vmatpush1.bf16.msra.mxu1 %v3121_v19 }
 0x205   : > { %1188 = vmatprep.subr.bf16.mxu1 %v3122_v20 }
 0x206   : > { %1474 = vmatpush1.bf16.msra.mxu0 %v3068_v32  ;;  %v3140_v32 = vld [vmem:[#allocation13 + $0xa4] ss:$8 sps:$4 sm:$0xff]  }
 0x207   : > { %1475 = vmatprep.subr.bf16.mxu0 %v3073_v33  ;;  %v3142_v33 = vld [vmem:[#allocation13 + $0xa0] ss:$8 sps:$4 sm:$0xff]  }
 0x208   : > { %1189 = vmatpush1.bf16.msra.mxu1 %v3124_v21 }
 0x209   : > { %1190 = vmatprep.subr.bf16.mxu1 %v3125_v22  ;;  %v3149_v22 = vld [vmem:[#allocation15 + $0x70] ss:$8 sps:$4 sm:$0xff]  }
 0x20a   : > { %1476 = vmatpush1.bf16.msra.mxu0 %v3071_v35  ;;  %v3143_v35 = vld [vmem:[#allocation13 + $0x94] ss:$8 sps:$4 sm:$0xff]  }
 0x20b   : > { %1477 = vmatprep.subr.bf16.mxu0 %v3076_v36  ;;  %v3145_v36 = vld [vmem:[#allocation13 + $0x90] ss:$8 sps:$4 sm:$0xff]  }
 0x20c   : > { %1191 = vmatpush2.bf16.msra.mxu1 %v3127_v23 }
 0x20d   : > { %1192 = vmatprep.subr.bf16.mxu1 %v3128_v24  ;;  %v3154_v24 = vld [vmem:[#allocation15 + $0x64] ss:$8 sps:$4 sm:$0xff]  }
 0x20e   : > { %1478 = vmatpush1.bf16.msra.mxu0 %v3074_v37  ;;  %v3146_v37 = vld [vmem:[#allocation13 + $0x84] ss:$8 sps:$4 sm:$0xff]  }
 0x20f   : > { %1479 = vmatprep.subr.bf16.mxu0 %v3079_v38 }
 0x210   : > { %1193 = vmatpush2.bf16.msra.mxu1 %v3130_v25  ;;  %v3152_v25 = vld [vmem:[#allocation15 + $0x60] ss:$8 sps:$4 sm:$0xff]  }
 0x211   : > { %1194 = vmatprep.subr.bf16.mxu1 %v3131_v26  ;;  %v3157_v26 = vld [vmem:[#allocation15 + $0x54] ss:$8 sps:$4 sm:$0xff]  }
 0x212   : > { %1480 = vmatpush2.bf16.msra.mxu0 %v3077_v39  ;;  %v3148_v39 = vld [vmem:[#allocation13 + $0x80] ss:$8 sps:$4 sm:$0xff]  }
 0x213   : > { %1481 = vmatprep.subr.bf16.mxu0 %v3082_v40 }
 0x214   : > { %1195 = vmatpush2.bf16.msra.mxu1 %v3133_v27  ;;  %v3155_v27 = vld [vmem:[#allocation15 + $0x50] ss:$8 sps:$4 sm:$0xff]  }
 0x215   : > { %1196 = vmatprep.subr.bf16.mxu1 %v3134_v28  ;;  %v3160_v28 = vld [vmem:[#allocation15 + $0x44] ss:$8 sps:$4 sm:$0xff]  }
 0x216   : > { %1482 = vmatpush2.bf16.msra.mxu0 %v3080_v41 }
 0x217   : > { %1483 = vmatprep.subr.bf16.mxu0 %v3085_v42 }
 0x218   : > { %1197 = vmatpush2.bf16.msra.mxu1 %v3136_v29  ;;  %v3158_v29 = vld [vmem:[#allocation15 + $0x40] ss:$8 sps:$4 sm:$0xff]  }
 0x219   : > { %1198 = vmatprep.subr.bf16.mxu1 %v3137_v30  ;;  %v3163_v30 = vld [vmem:[#allocation15 + $0x34] ss:$8 sps:$4 sm:$0xff]  }
 0x21a   : > { %1484 = vmatpush2.bf16.msra.mxu0 %v3083_v43 }
 0x21b   : > { %1485 = vmatprep.subr.bf16.mxu0 %v3088_v44 }
 0x21c   : > { %1199 = vmatpush2.bf16.msra.mxu1 %v3139_v31  ;;  %v3161_v31 = vld [vmem:[#allocation15 + $0x30] ss:$8 sps:$4 sm:$0xff]  }
 0x21d   : > { %1200 = vmatprep.subr.bf16.mxu1 %v3140_v32  ;;  %v3166_v32 = vld [vmem:[#allocation15 + $0x24] ss:$8 sps:$4 sm:$0xff]  }
 0x21e   : > { %1486 = vmatpush2.bf16.msra.mxu0 %v3086_v45 }
 0x21f   : > { %1487 = vmatprep.subr.bf16.mxu0 %v3091_v46 }
 0x220   : > { %1201 = vmatpush2.bf16.msra.mxu1 %v3142_v33  ;;  %v3164_v33 = vld [vmem:[#allocation15 + $0x20] ss:$8 sps:$4 sm:$0xff]  }
 0x221   : > { %1202 = vmatprep.subr.bf16.mxu1 %v3143_v35  ;;  %v3169_v35 = vld [vmem:[#allocation15 + $0x14] ss:$8 sps:$4 sm:$0xff]  }
 0x222   : > { %1488 = vmatpush2.bf16.msra.mxu0 %v3089_v47 }
 0x223   : > { %1489 = vmatprep.subr.bf16.mxu0 %v3094_v48 }
 0x224   : > { %1203 = vmatpush2.bf16.msra.mxu1 %v3145_v36  ;;  %v3167_v36 = vld [vmem:[#allocation15 + $0x10] ss:$8 sps:$4 sm:$0xff]  }
 0x225   : > { %1204 = vmatprep.subr.bf16.mxu1 %v3146_v37  ;;  %v3172_v37 = vld [vmem:[#allocation15 + $0x4] ss:$8 sps:$4 sm:$0xff]  }
 0x226   : > { %1490 = vmatpush2.bf16.msra.mxu0 %v3092_v49 }
 0x227   : > { %1491 = vmatprep.subr.bf16.mxu0 %v3097_v50 }
 0x228   : > { %1205 = vmatpush2.bf16.msra.mxu1 %v3148_v39  ;;  %v3175_v39 = vld [vmem:[#allocation15 + $0xf4] ss:$8 sps:$4 sm:$0xff]  }
 0x22a   : > { %1492 = vmatpush2.bf16.msra.mxu0 %v3095_v52 }
 0x22b   : > { %1493 = vmatprep.subr.bf16.mxu0 %v3100_v55 }
 0x22e   : > { %1494 = vmatpush2.bf16.msra.mxu0 %v3098_v57 }
 0x231   : > { %1496 = vmatmul.mubr.bf16.vlgmr.msra.gmra.mxu0 %v1269_v59 }
 0x27c   : > { %v728_v45 = vpop.xlane.xlu1 %727 }
 0x27d   : > { %v729_v46 = vmul.f32 0.00390625, %v728_v45  ;;  %v3184_v45 = vld [vmem:[#allocation15 + $0xc4] ss:$8 sps:$4 sm:$0xff]  }
 0x27f   : > { %v730_v47 = vadd.f32 1e-05, %v729_v46  ;;  %v3182_v46 = vld [vmem:[#allocation15 + $0xc0] ss:$8 sps:$4 sm:$0xff]  }
 0x281   : > { %3297 = vrsqrt.f32 %v730_v47  ;;  %v3187_v47 = vld [vmem:[#allocation15 + $0xb4] ss:$8 sps:$4 sm:$0xff]  }
 0x28e   : > { %v3298_v48 = vpop.eup %3297 }
 0x28f   : > { %v733_v49 = vmul.f32 %v3298_v48, %v4047_v34  ;;  %v732_v50 = vmul.f32 %v3298_v48, %v4044_v62  ;;  %v3185_v48 = vld [vmem:[#allocation15 + $0xb0] ss:$8 sps:$4 sm:$0xff]  }
 0x291   : > { %v735_v51 = vmul.f32 %v733_v49, %v4020_v5  ;;  %v734_v52 = vmul.f32 %v732_v50, %v4017_v4  ;;  %v3190_v49 = vld [vmem:[#allocation15 + $0xa4] ss:$8 sps:$4 sm:$0xff]   ;;  %v3188_v50 = vld [vmem:[#allocation15 + $0xa0] ss:$8 sps:$4 sm:$0xff]  }
 0x293   : > { %v737_v55 = vadd.f32 %v735_v51, %v4026_v9  ;;  %v736_v56 = vadd.f32 %v734_v52, %v4023_v8  ;;  %v3193_v51 = vld [vmem:[#allocation15 + $0x94] ss:$8 sps:$4 sm:$0xff]   ;;  %v3191_v52 = vld [vmem:[#allocation15 + $0x90] ss:$8 sps:$4 sm:$0xff]  }
 0x295   : > { %v739_v57 = vpack.c.bf16 %v737_v55, %v737_v55  ;;  %v738_v58 = vpack.c.bf16 %v736_v56, %v736_v56  ;;  %v3196_v55 = vld [vmem:[#allocation15 + $0x84] ss:$8 sps:$4 sm:$0xff]   ;;  %v3194_v56 = vld [vmem:[#allocation15 + $0x80] ss:$8 sps:$4 sm:$0xff]  }
 0x297   : > { %1206 = vmatprep.mubr.bf16.mxu1 %v739_v57  ;;  %v3197_v57 = vld [vmem:[#allocation16 + $0x70] ss:$8 sps:$4 sm:$0xff]  }
 0x298   : > { %1207 = vmatmul.mubr.bf16.vlgmr.msra.gmra.mxu1 %v738_v58  ;;  %v3199_v58 = vld [vmem:[#allocation16 + $0x74] ss:$8 sps:$4 sm:$0xff]  }
 0x299   : > { %1615 = vmatprep.mubr.bf16.mxu1 %v3662_v17  ;;  %v3233_v17 = vld [vmem:[#allocation16 + $0xb0] ss:$8 sps:$4 sm:$0xff]  }
 0x2b1   : > { %v966_v38 = vpop.f32.mrf.mxu0 }
 0x2b2   : > { %v2865_v42 = vpack.c.bf16 %v966_v38, %v966_v38  ;;  %v3170_v38 = vld [vmem:[#allocation15] ss:$8 sps:$4 sm:$0xff]  }
 0x2b3   : > { %v968_v40 = vpop.f32.mrf.mxu0 }
 0x2b4   : > { %v2866_v41 = vpack.c.bf16 %v968_v40, %v968_v40  ;;  %v3173_v40 = vld [vmem:[#allocation15 + $0xf0] ss:$8 sps:$4 sm:$0xff]  }
 0x2b5   : > { %v970_v43 = vpop.f32.mrf.mxu0 }
 0x2b6   : > { %1528 = vmatprep.subr.bf16.mxu0 %v2866_v41  ;;  %v3178_v41 = vld [vmem:[#allocation15 + $0xe4] ss:$8 sps:$4 sm:$0xff]   ;;  %v3181_v43 = vld [vmem:[#allocation15 + $0xd4] ss:$8 sps:$4 sm:$0xff]  }
 0x2b7   : > { %v971_v44 = vpop.f32.mrf.mxu0  ;;  %1529 = vmatpush1.bf16.xpose.msra.mxu0 %v2865_v42  ;;  %v3176_v42 = vld [vmem:[#allocation15 + $0xe0] ss:$8 sps:$4 sm:$0xff]  }
 0x2b8   : > { %v3179_v44 = vld [vmem:[#allocation15 + $0xd0] ss:$8 sps:$4 sm:$0xff]   ;;  %2079 = vmatprep.subr.bf16.mxu0 %v3199_v58  ;;  %v3262_v58 = vld [vmem:[#allocation18 + $0x24] ss:$8 sps:$4 sm:$0xff]  }
 0x2f1   : > { %v1497_v59 = vpop.f32.mrf.mxu0 }
 0x2f2   : > { %v1504_v63 = vpack.c.bf16 %v1497_v59, %v1497_v59  ;;  %v3202_v59 = vld [vmem:[#allocation16 + $0x64] ss:$8 sps:$4 sm:$0xff]  }
 0x2f3   : > { %v1499_v60 = vpop.f32.mrf.mxu0 }
 0x2f4   : > { %v1505_v61 = vpack.c.bf16 %v1499_v60, %v1499_v60  ;;  %v3200_v60 = vld [vmem:[#allocation16 + $0x60] ss:$8 sps:$4 sm:$0xff]  }
 0x2f5   : > { %v1501_v2 = vpop.f32.mrf.mxu0 }
 0x2f6   : > { %1546 = vmatprep.mubr.bf16.mxu0 %v1505_v61  ;;  %v3205_v61 = vld [vmem:[#allocation16 + $0x54] ss:$8 sps:$4 sm:$0xff]   ;;  %v3208_v2 = vld [vmem:[#allocation16 + $0x44] ss:$8 sps:$4 sm:$0xff]  }
 0x2f7   : > { %v1502_v34 = vpop.f32.mrf.mxu0  ;;  %1547 = vmatmul.mubr.bf16.vlgmr.msra.gmra.mxu0 %v1504_v63  ;;  %v3203_v63 = vld [vmem:[#allocation16 + $0x50] ss:$8 sps:$4 sm:$0xff]  }
 0x2f8   : > { %2080 = vmatpush1.bf16.msra.mxu0 %v3197_v57  ;;  %v3206_v34 = vld [vmem:[#allocation16 + $0x40] ss:$8 sps:$4 sm:$0xff]   ;;  %v3257_v57 = vld [vmem:[#allocation18 + $0x30] ss:$8 sps:$4 sm:$0xff]  }
 0x2f9   : > { %2081 = vmatprep.subr.bf16.mxu0 %v3202_v59  ;;  %v3260_v59 = vld [vmem:[#allocation18 + $0x20] ss:$8 sps:$4 sm:$0xff]  }
 0x2fc   : > { %2082 = vmatpush1.bf16.msra.mxu0 %v3200_v60  ;;  %v3265_v60 = vld [vmem:[#allocation18 + $0x14] ss:$8 sps:$4 sm:$0xff]  }
 0x2fd   : > { %2083 = vmatprep.subr.bf16.mxu0 %v3205_v61  ;;  %v3263_v61 = vld [vmem:[#allocation18 + $0x10] ss:$8 sps:$4 sm:$0xff]  }
 0x300   : > { %2084 = vmatpush1.bf16.msra.mxu0 %v3203_v63  ;;  %v3268_v63 = vld [vmem:[#allocation18 + $0x4] ss:$8 sps:$4 sm:$0xff]  }
 0x301   : > { %2085 = vmatprep.subr.bf16.mxu0 %v3208_v2  ;;  %v3266_v2 = vld [vmem:[#allocation18] ss:$8 sps:$4 sm:$0xff]  }
 0x304   : > { %2086 = vmatpush1.bf16.msra.mxu0 %v3206_v34  ;;  %v3271_v34 = vld [vmem:[#allocation18 + $0xf4] ss:$8 sps:$4 sm:$0xff]  }
 0x358   : > { %v1208_v62 = vpop.f32.mrf.mxu1 }
 0x359   : > { %v2867_v5 = vpack.c.bf16 %v1208_v62, %v1208_v62  ;;  %v3211_v62 = vld [vmem:[#allocation16 + $0x34] ss:$8 sps:$4 sm:$0xff]  }
 0x35a   : > { %v1210_v4 = vpop.f32.mrf.mxu1  ;;  %2087 = vmatprep.subr.bf16.mxu0 %v3211_v62  ;;  %v3269_v62 = vld [vmem:[#allocation18 + $0xf0] ss:$8 sps:$4 sm:$0xff]  }
 0x35b   : > { %v1578_v3 = vsel %vm1576_vm0, %v2867_v5, 0  ;;  %v2868_v9 = vpack.c.bf16 %v1210_v4, %v1210_v4  ;;  %v3209_v5 = vld [vmem:[#allocation16 + $0x30] ss:$8 sps:$4 sm:$0xff]   ;;  %v3214_v4 = vld [vmem:[#allocation16 + $0x24] ss:$8 sps:$4 sm:$0xff]  }
 0x35c   : > { %v1212_v6 = vpop.f32.mrf.mxu1  ;;  %2088 = vmatpush1.bf16.msra.mxu0 %v3209_v5  ;;  %v3274_v5 = vld [vmem:[#allocation18 + $0xe4] ss:$8 sps:$4 sm:$0xff]  }
 0x35d   : > { %2756 = vmatprep.subr.msk.bf16.mxu1 %vm1576_vm0, %v2868_v9  ;;  %2089 = vmatprep.subr.bf16.mxu0 %v3214_v4  ;;  %v3217_v9 = vld [vmem:[#allocation16 + $0x14] ss:$8 sps:$4 sm:$0xff]   ;;  %v3215_v6 = vld [vmem:[#allocation16 + $0x10] ss:$8 sps:$4 sm:$0xff]   ;;  %v3272_v4 = vld [vmem:[#allocation18 + $0xe0] ss:$8 sps:$4 sm:$0xff]  }
 0x35e   : > { %v1213_v8 = vpop.f32.mrf.mxu1  ;;  %1598 = vmatpush1.bf16.msra.mxu1 %v1578_v3  ;;  %v3212_v3 = vld [vmem:[#allocation16 + $0x20] ss:$8 sps:$4 sm:$0xff]  }
 0x35f   : > { %1830 = vmatprep.subr.bf16.mxu1 %v3151_v18  ;;  %v3220_v8 = vld [vmem:[#allocation16 + $0x4] ss:$8 sps:$4 sm:$0xff]  }
 0x360   : > { %2090 = vmatpush1.bf16.msra.mxu0 %v3212_v3  ;;  %v3238_v18 = vld [vmem:[#allocation16 + $0xa4] ss:$8 sps:$4 sm:$0xff]   ;;  %v3277_v3 = vld [vmem:[#allocation18 + $0xd4] ss:$8 sps:$4 sm:$0xff]  }
 0x361   : > { %2091 = vmatprep.subr.bf16.mxu0 %v3217_v9  ;;  %v3275_v9 = vld [vmem:[#allocation18 + $0xd0] ss:$8 sps:$4 sm:$0xff]  }
 0x364   : > { %2092 = vmatpush1.bf16.msra.mxu0 %v3215_v6  ;;  %v3280_v6 = vld [vmem:[#allocation18 + $0xc4] ss:$8 sps:$4 sm:$0xff]  }
 0x365   : > { %2093 = vmatprep.subr.bf16.mxu0 %v3220_v8  ;;  %v3278_v8 = vld [vmem:[#allocation18 + $0xc0] ss:$8 sps:$4 sm:$0xff]  }
 0x3b7   : > { %v1548_v7 = vpop.f32.mrf.mxu0 }
 0x3b8   : > { %v1555_v10 = vsel %vm1554_vm1, %v1548_v7, -inf }
 0x3b9   : > { %1556 = vmax.xlane.f32.xlu0 %v1555_v10  ;;  %v1550_v11 = vpop.f32.mrf.mxu0  ;;  %v3223_v10 = vld [vmem:[#allocation16 + $0xf4] ss:$8 sps:$4 sm:$0xff]  }
 0x3ba   : > { %v3221_v11 = vld [vmem:[#allocation16 + $0xf0] ss:$8 sps:$4 sm:$0xff]  }
 0x3bb   : > { %v1551_v53 = vpop.f32.mrf.mxu0 }
 0x3bc   : > { %v3226_v53 = vld [vmem:[#allocation16 + $0xe4] ss:$8 sps:$4 sm:$0xff]  }
 0x3bd   : > { %v1552_v12 = vpop.f32.mrf.mxu0 }
 0x3be   : > { %v3224_v12 = vld [vmem:[#allocation16 + $0xe0] ss:$8 sps:$4 sm:$0xff]  }
 0x442   : > { %v1557_v54 = vpop.xlane.xlu0 %1556 }
 0x443   : > { %v1558_v13 = vsub.f32 %v1548_v7, %v1557_v54  ;;  %v3218_v7 = vld [vmem:[#allocation16] ss:$8 sps:$4 sm:$0xff]   ;;  %v3229_v54 = vld [vmem:[#allocation16 + $0xd4] ss:$8 sps:$4 sm:$0xff]  }
 0x444   : > { %2094 = vmatpush1.bf16.msra.mxu0 %v3218_v7  ;;  %v3283_v7 = vld [vmem:[#allocation18 + $0xb4] ss:$8 sps:$4 sm:$0xff]  }
 0x445   : > { %v1559_v14 = vmul.f32 1.442695, %v1558_v13  ;;  %2095 = vmatprep.subr.bf16.mxu0 %v3223_v10  ;;  %v3227_v13 = vld [vmem:[#allocation16 + $0xd0] ss:$8 sps:$4 sm:$0xff]  }
 0x446   : > { %v3281_v10 = vld [vmem:[#allocation18 + $0xb0] ss:$8 sps:$4 sm:$0xff]  }
 0x447   : > { %3299 = vpow2.f32 %v1559_v14  ;;  %v3232_v14 = vld [vmem:[#allocation16 + $0xc4] ss:$8 sps:$4 sm:$0xff]  }
 0x448   : > { %2096 = vmatpush2.bf16.msra.mxu0 %v3221_v11  ;;  %v3286_v11 = vld [vmem:[#allocation18 + $0xa4] ss:$8 sps:$4 sm:$0xff]  }
 0x449   : > { %2097 = vmatprep.subr.bf16.mxu0 %v3226_v53  ;;  %v3284_v53 = vld [vmem:[#allocation18 + $0xa0] ss:$8 sps:$4 sm:$0xff]  }
 0x44c   : > { %2098 = vmatpush2.bf16.msra.mxu0 %v3224_v12  ;;  %v3289_v12 = vld [vmem:[#allocation18 + $0x94] ss:$8 sps:$4 sm:$0xff]  }
 0x44d   : > { %2099 = vmatprep.subr.bf16.mxu0 %v3229_v54  ;;  %v3287_v54 = vld [vmem:[#allocation18 + $0x90] ss:$8 sps:$4 sm:$0xff]  }
 0x450   : > { %2100 = vmatpush2.bf16.msra.mxu0 %v3227_v13  ;;  %v3290_v13 = vld [vmem:[#allocation18 + $0x80] ss:$8 sps:$4 sm:$0xff]  }
 0x451   : > { %2101 = vmatprep.subr.bf16.mxu0 %v3232_v14  ;;  %v3292_v14 = vld [vmem:[#allocation18 + $0x84] ss:$8 sps:$4 sm:$0xff]  }
 0x454   : > { %v3300_v15 = vpop.eup %3299 }
 0x455   : > { %v1561_v16 = vsel %vm1554_vm1, %v3300_v15, 0.0 }
 0x456   : > { %1562 = vadd.xlane.f32.xlu1 %v1561_v16  ;;  %v3235_v16 = vld [vmem:[#allocation16 + $0xb4] ss:$8 sps:$4 sm:$0xff]  }
 0x4df   : > { %v1563_v19 = vpop.xlane.xlu1 %1562 }
 0x4e0   : > { %3301 = vrcp.f32 %v1563_v19  ;;  %v3236_v19 = vld [vmem:[#allocation16 + $0xa0] ss:$8 sps:$4 sm:$0xff]  }
 0x4ed   : > { %v3302_v20 = vpop.eup %3301 }
 0x4ee   : > { %v1565_v21 = vmul.f32 %v3302_v20, %v3300_v15  ;;  %v3230_v15 = vld [vmem:[#allocation16 + $0xc0] ss:$8 sps:$4 sm:$0xff]  }
 0x4ef   : > { %2102 = vmatpush2.bf16.msra.mxu0 %v3230_v15  ;;  %v1907_v15 = vld [vmem:[%s4215_s28] sm:$0x3] }
 0x4f0   : > { %v1566_v23 = vpack.c.bf16 %v1565_v21, %v1565_v21  ;;  %2103 = vmatprep.subr.bf16.mxu0 %v3235_v16  ;;  %v1912_v16 = vrot.slane %v1907_v15, %v4006_v0 }
 0x4f2   : > { %2757 = vmatmul.mubr.msk.bf16.vlgmr.msra.gmra.mxu1 %vm1554_vm1, %v1566_v23 }
 0x4f3   : > { %1831 = vmatpush1.bf16.msra.mxu1 %v3149_v22  ;;  %2104 = vmatpush2.bf16.msra.mxu0 %v3233_v17  ;;  %v1916_v17 = vrot.slane %v1907_v15, %v4008_v1 }
 0x4f4   : > { %1832 = vmatprep.subr.bf16.mxu1 %v3154_v24  ;;  %2105 = vmatprep.subr.bf16.mxu0 %v3238_v18 }
 0x4f7   : > { %1833 = vmatpush1.bf16.msra.mxu1 %v3152_v25  ;;  %2106 = vmatpush2.bf16.msra.mxu0 %v3236_v19 }
 0x4f8   : > { %1834 = vmatprep.subr.bf16.mxu1 %v3157_v26  ;;  %v3241_v26 = vld [vmem:[#allocation16 + $0x94] ss:$8 sps:$4 sm:$0xff]  }
 0x4f9   : > { %2107 = vmatprep.subr.bf16.mxu0 %v3241_v26 }
 0x4fb   : > { %1835 = vmatpush1.bf16.msra.mxu1 %v3155_v27  ;;  %v3239_v27 = vld [vmem:[#allocation16 + $0x90] ss:$8 sps:$4 sm:$0xff]  }
 0x4fc   : > { %1836 = vmatprep.subr.bf16.mxu1 %v3160_v28  ;;  %2108 = vmatpush2.bf16.msra.mxu0 %v3239_v27  ;;  %v3244_v28 = vld [vmem:[#allocation16 + $0x84] ss:$8 sps:$4 sm:$0xff]  }
 0x4fd   : > { %2109 = vmatprep.subr.bf16.mxu0 %v3244_v28 }
 0x4ff   : > { %1837 = vmatpush1.bf16.msra.mxu1 %v3158_v29  ;;  %v3242_v29 = vld [vmem:[#allocation16 + $0x80] ss:$8 sps:$4 sm:$0xff]  }
 0x500   : > { %1838 = vmatprep.subr.bf16.mxu1 %v3163_v30  ;;  %2110 = vmatpush2.bf16.msra.mxu0 %v3242_v29  ;;  %v3245_v30 = vld [vmem:[#allocation18 + $0x70] ss:$8 sps:$4 sm:$0xff]  }
 0x503   : > { %1839 = vmatpush1.bf16.msra.mxu1 %v3161_v31  ;;  %v3247_v31 = vld [vmem:[#allocation18 + $0x74] ss:$8 sps:$4 sm:$0xff]  }
 0x504   : > { %1840 = vmatprep.subr.bf16.mxu1 %v3166_v32  ;;  %v3250_v32 = vld [vmem:[#allocation18 + $0x64] ss:$8 sps:$4 sm:$0xff]  }
 0x507   : > { %1841 = vmatpush1.bf16.msra.mxu1 %v3164_v33  ;;  %v3248_v33 = vld [vmem:[#allocation18 + $0x60] ss:$8 sps:$4 sm:$0xff]  }
 0x508   : > { %1842 = vmatprep.subr.bf16.mxu1 %v3169_v35  ;;  %v1658_v35 = vld [vmem:[%s4143_s7] sm:$0x3] }
 0x50b   : > { %1843 = vmatpush1.bf16.msra.mxu1 %v3167_v36  ;;  %v1663_v36 = vrot.slane %v1658_v35, %v4006_v0 }
 0x50c   : > { %1844 = vmatprep.subr.bf16.mxu1 %v3172_v37  ;;  %v1667_v37 = vrot.slane %v1658_v35, %v4008_v1 }
 0x50f   : > { %1845 = vmatpush1.bf16.msra.mxu1 %v3170_v38 }
 0x510   : > { %1846 = vmatprep.subr.bf16.mxu1 %v3175_v39 }
 0x513   : > { %1847 = vmatpush2.bf16.msra.mxu1 %v3173_v40 }
 0x514   : > { %1848 = vmatprep.subr.bf16.mxu1 %v3178_v41 }
 0x517   : > { %1849 = vmatpush2.bf16.msra.mxu1 %v3176_v42  ;;  %v3311_v42 = vld [vmem:[%s3957_s26] sm:$0xff] }
 0x518   : > { %1850 = vmatprep.subr.bf16.mxu1 %v3181_v43 }
 0x51b   : > { %1851 = vmatpush2.bf16.msra.mxu1 %v3179_v44 }
 0x51c   : > { %1852 = vmatprep.subr.bf16.mxu1 %v3184_v45  ;;  %v3312_v45 = vld [vmem:[%s3957_s26 + $0x8] sm:$0xff]  ;;  %s661_s26 = scalar_lea.vmem [#allocation19], %s3953_s29  ;;  %s3663_s29 = smov [#allocation19]  }
 0x51d   : > { %s2440_s5 = sshll.u32 %s661_s26, 4  ;;  %s3557_s18 = sshll.u32 %s3663_s29, 4  ;;  %s2441_s5 = int_to_ptr.vmem [resolvable:$true] %s2440_s5  ;;  %s3558_s18 = int_to_ptr.vmem [resolvable:$false] %s3557_s18 }
 0x51e   : > { %s3553_s25 = scalar_lea.vmem %s2441_s5, 256  ;;  %s3559_s14 = scalar_lea.vmem %s3558_s18, 512 }
 0x51f   : > { %1853 = vmatpush2.bf16.msra.mxu1 %v3182_v46  ;;  %p3554_p1 = scmp.ne.s32.totalorder %s2441_s5, %s3553_s25  ;;  %p3560_p6 = scmp.lt.s32.totalorder %s2441_s5, %s3558_s18 }
 0x520   : > { %1854 = vmatprep.subr.bf16.mxu1 %v3187_v47  ;;  %p3561_p4 = scmp.lt.s32.totalorder %s3559_s14, %s3553_s25 }
 0x521   : > { %p3555_p5 = pnand %p3554_p1, %p4220_p3 }
 0x522   : > { %p3562_p13 = por %p3561_p4, %p3560_p6 }
 0x523   : > { %1855 = vmatpush2.bf16.msra.mxu1 %v3185_v48  ;;  %p3556_p7 = pneg %p3555_p5 }
 0x524   : > { %1856 = vmatprep.subr.bf16.mxu1 %v3190_v49 }
 0x525   : > { %p3563_p10 = pnand %p3562_p13, %p3556_p7 }
 0x527   : > { %1857 = vmatpush2.bf16.msra.mxu1 %v3188_v50  ;;  %v3253_v50 = vld [vmem:[#allocation18 + $0x54] ss:$8 sps:$4 sm:$0xff]  }
 0x528   : > { %1858 = vmatprep.subr.bf16.mxu1 %v3193_v51  ;;  %v3251_v51 = vld [vmem:[#allocation18 + $0x50] ss:$8 sps:$4 sm:$0xff]  }
 0x52b   : > { %1859 = vmatpush2.bf16.msra.mxu1 %v3191_v52  ;;  %v3256_v52 = vld [vmem:[#allocation18 + $0x44] ss:$8 sps:$4 sm:$0xff]  }
 0x52c   : > { %1860 = vmatprep.subr.bf16.mxu1 %v3196_v55  ;;  %v3254_v55 = vld [vmem:[#allocation18 + $0x40] ss:$8 sps:$4 sm:$0xff]  }
 0x52f   : > { %1861 = vmatpush2.bf16.msra.mxu1 %v3194_v56  ;;  %v3259_v56 = vld [vmem:[#allocation18 + $0x34] ss:$8 sps:$4 sm:$0xff]  }
 0x530   : > { %2378 = vmatprep.subr.bf16.mxu1 %v3247_v31 }
 0x5b2   : > { %v1617_v20 = vpop.f32.mrf.mxu1 }
 0x5b3   : > { %v1624_v23 = vpack.c.bf16 %v1617_v20, %v1617_v20 }
 0x5b4   : > { %v1619_v21 = vpop.f32.mrf.mxu1 }
 0x5b5   : > { %v1625_v22 = vpack.c.bf16 %v1619_v21, %v1619_v21 }
 0x5b6   : > { %v1621_v24 = vpop.f32.mrf.mxu1 }
 0x5b7   : > { %1862 = vmatprep.mubr.bf16.mxu1 %v1625_v22 }
 0x5b8   : > { %v1622_v25 = vpop.f32.mrf.mxu1  ;;  %1863 = vmatmul.mubr.bf16.vlgmr.msra.gmra.mxu1 %v1624_v23 }
 0x5b9   : > { %2379 = vmatpush1.bf16.msra.mxu1 %v3245_v30 }
 0x5ba   : > { %2380 = vmatprep.subr.bf16.mxu1 %v3250_v32 }
 0x5bd   : > { %2381 = vmatpush1.bf16.msra.mxu1 %v3248_v33 }
 0x5be   : > { %2382 = vmatprep.subr.bf16.mxu1 %v3253_v50 }
 0x5c1   : > { %2383 = vmatpush1.bf16.msra.mxu1 %v3251_v51 }
 0x5c2   : > { %2384 = vmatprep.subr.bf16.mxu1 %v3256_v52 }
 0x5c5   : > { %2385 = vmatpush1.bf16.msra.mxu1 %v3254_v55 }
 0x5c6   : > { %2386 = vmatprep.subr.bf16.mxu1 %v3259_v56 }
 0x5c9   : > { %2387 = vmatpush1.bf16.msra.mxu1 %v3257_v57 }
 0x5ca   : > { %2388 = vmatprep.subr.bf16.mxu1 %v3262_v58 }
 0x5cd   : > { %2389 = vmatpush1.bf16.msra.mxu1 %v3260_v59 }
 0x5ce   : > { %2390 = vmatprep.subr.bf16.mxu1 %v3265_v60 }
 0x5d1   : > { %2391 = vmatpush1.bf16.msra.mxu1 %v3263_v61 }
 0x5d2   : > { %2392 = vmatprep.subr.bf16.mxu1 %v3268_v63 }
 0x5d5   : > { %2393 = vmatpush1.bf16.msra.mxu1 %v3266_v2 }
 0x5d6   : > { %2394 = vmatprep.subr.bf16.mxu1 %v3271_v34 }
 0x5d9   : > { %2395 = vmatpush2.bf16.msra.mxu1 %v3269_v62 }
 0x5da   : > { %2396 = vmatprep.subr.bf16.mxu1 %v3274_v5 }
 0x5dd   : > { %2397 = vmatpush2.bf16.msra.mxu1 %v3272_v4 }
 0x5de   : > { %2398 = vmatprep.subr.bf16.mxu1 %v3277_v3 }
 0x5e1   : > { %2399 = vmatpush2.bf16.msra.mxu1 %v3275_v9 }
 0x5e2   : > { %2400 = vmatprep.subr.bf16.mxu1 %v3280_v6 }
 0x5e5   : > { %2401 = vmatpush2.bf16.msra.mxu1 %v3278_v8 }
 0x5e6   : > { %2402 = vmatprep.subr.bf16.mxu1 %v3283_v7 }
 0x5e9   : > { %2403 = vmatpush2.bf16.msra.mxu1 %v3281_v10 }
 0x5ea   : > { %2404 = vmatprep.subr.bf16.mxu1 %v3286_v11 }
 0x5ed   : > { %2405 = vmatpush2.bf16.msra.mxu1 %v3284_v53 }
 0x5ee   : > { %2406 = vmatprep.subr.bf16.mxu1 %v3289_v12 }
 0x5f1   : > { %2407 = vmatpush2.bf16.msra.mxu1 %v3287_v54 }
 0x5f2   : > { %2408 = vmatprep.subr.bf16.mxu1 %v3292_v14 }
 0x5f5   : > { %2409 = vmatpush2.bf16.msra.mxu1 %v3290_v13 }
 0x678   : > { %v1864_v38 = vpop.f32.mrf.mxu1 }
 0x679   : > { %v1865_v39 = vadd.f32 %v1864_v38, %v1663_v36 }
 0x67a   : > { %v1866_v40 = vpop.f32.mrf.mxu1 }
 0x67b   : > { %v1867_v41 = vadd.f32 %v1866_v40, %v1667_v37  ;;  %v4068_v43 = vadd.f32 %v3311_v42, %v1865_v39 }
 0x67c   : > { %v1868_v44 = vpop.f32.mrf.mxu1 }
 0x67d   : > { %v4071_v46 = vadd.f32 %v3312_v45, %v1867_v41  ;;  %v1873_v49 = vpack.c.bf16 %v4068_v43, %v4068_v43 }
 0x67e   : > { %v1869_v47 = vpop.f32.mrf.mxu1 }
 0x67f   : > { %v1874_v48 = vpack.c.bf16 %v4071_v46, %v4071_v46 }
 0x681   : > { %2111 = vmatprep.mubr.bf16.mxu0 %v1874_v48 }
 0x682   : > { %2112 = vmatmul.mubr.bf16.vlgmr.msra.gmra.mxu0 %v1873_v49 }
 0x742   : > { %v2113_v18 = vpop.f32.mrf.mxu0 }
 0x743   : > { %v2114_v19 = vadd.f32 %v2113_v18, %v1912_v16  ;;  %v2206_v16 = vld [vmem:[%s4217_s3] sm:$0x3] }
 0x744   : > { %v2115_v20 = vpop.f32.mrf.mxu0  ;;  %v2215_v18 = vrot.slane %v2206_v16, %v4008_v1 }
 0x745   : > { %v2122_v21 = vmul.f32 0.70710677, %v2114_v19  ;;  %v2116_v22 = vadd.f32 %v2115_v20, %v1916_v17  ;;  %v2120_v10 = vmul.f32 0.5, %v2114_v19  ;;  %v2211_v17 = vrot.slane %v2206_v16, %v4006_v0 }
 0x746   : > { %v2117_v23 = vpop.f32.mrf.mxu0 }
 0x747   : > { %v2124_v24 = vand.u32 2147483647, %v2122_v21  ;;  %v2123_v25 = vmul.f32 0.70710677, %v2116_v22  ;;  %vm2162_vm2 = vcmp.lt.f32.partialorder %v2122_v21, 0.0  ;;  %v2121_v53 = vmul.f32 0.5, %v2116_v22 }
 0x748   : > { %v2118_v26 = vpop.f32.mrf.mxu0 }
 0x749   : > { %v2126_v27 = vmul.f32 0.3275911, %v2124_v24  ;;  %v2125_v28 = vand.u32 2147483647, %v2123_v25  ;;  %v2150_v32 = vsub.f32 0.0, %v2124_v24  ;;  %vm2163_vm3 = vcmp.lt.f32.partialorder %v2123_v25, 0.0 }
 0x74b   : > { %v2128_v29 = vadd.f32 1.0, %v2126_v27  ;;  %v2127_v30 = vmul.f32 0.3275911, %v2125_v28  ;;  %v2151_v33 = vsub.f32 0.0, %v2125_v28  ;;  %v2152_v35 = vmul.f32 %v2150_v32, %v2124_v24 }
 0x74d   : > { %3303 = vrcp.f32 %v2128_v29  ;;  %v2129_v31 = vadd.f32 1.0, %v2127_v30  ;;  %v2153_v37 = vmul.f32 %v2151_v33, %v2125_v28  ;;  %v2154_v39 = vmul.f32 1.442695, %v2152_v35 }
 0x74f   : > { %3305 = vrcp.f32 %v2129_v31  ;;  %v2156_v42 = vmul.f32 1.442695, %v2153_v37 }
 0x750   : > { %3307 = vpow2.f32 %v2154_v39 }
 0x751   : > { %3309 = vpow2.f32 %v2156_v42 }
 0x75a   : > { %v3304_v36 = vpop.eup %3303 }
 0x75b   : > { %v2132_v38 = vmul.f32 1.0614054, %v3304_v36 }
 0x75c   : > { %v3306_v40 = vpop.eup %3305 }
 0x75d   : > { %v2134_v41 = vadd.f32 -1.4531521, %v2132_v38  ;;  %v2133_v44 = vmul.f32 1.0614054, %v3306_v40  ;;  %v3308_v61 = vpop.eup %3307 }
 0x75e   : > { %v3310_v62 = vpop.eup %3309 }
 0x75f   : > { %v2136_v45 = vmul.f32 %v3304_v36, %v2134_v41  ;;  %v2135_v47 = vadd.f32 -1.4531521, %v2133_v44 }
 0x761   : > { %v2138_v48 = vadd.f32 1.4214138, %v2136_v45  ;;  %v2137_v49 = vmul.f32 %v3306_v40, %v2135_v47 }
 0x763   : > { %v2140_v50 = vmul.f32 %v3304_v36, %v2138_v48  ;;  %v2139_v51 = vadd.f32 1.4214138, %v2137_v49 }
 0x765   : > { %v2142_v52 = vadd.f32 -0.28449672, %v2140_v50  ;;  %v2141_v55 = vmul.f32 %v3306_v40, %v2139_v51 }
 0x767   : > { %v2144_v56 = vmul.f32 %v3304_v36, %v2142_v52  ;;  %v2143_v57 = vadd.f32 -0.28449672, %v2141_v55 }
 0x769   : > { %v2146_v58 = vadd.f32 0.2548296, %v2144_v56  ;;  %v2145_v59 = vmul.f32 %v3306_v40, %v2143_v57 }
 0x76b   : > { %v2148_v60 = vmul.f32 %v3304_v36, %v2146_v58  ;;  %v2147_v63 = vadd.f32 0.2548296, %v2145_v59 }
 0x76d   : > { %v2158_v2 = vmul.f32 %v3308_v61, %v2148_v60  ;;  %v2149_v34 = vmul.f32 %v3306_v40, %v2147_v63 }
 0x76f   : > { %v2160_v5 = vsub.f32 1.0, %v2158_v2  ;;  %v2159_v4 = vmul.f32 %v3310_v62, %v2149_v34 }
 0x771   : > { %v2164_v3 = vsub.f32 0.0, %v2160_v5  ;;  %v2161_v9 = vsub.f32 1.0, %v2159_v4 }
 0x773   : > { %v2166_v6 = vsel %vm2162_vm2, %v2164_v3, %v2160_v5  ;;  %v2165_v7 = vsub.f32 0.0, %v2161_v9 }
 0x774   : > { %v2168_v8 = vadd.f32 1.0, %v2166_v6 }
 0x775   : > { %v2167_v11 = vsel %vm2163_vm3, %v2165_v7, %v2161_v9 }
 0x776   : > { %v2169_v12 = vadd.f32 1.0, %v2167_v11  ;;  %v2170_v54 = vmul.f32 %v2168_v8, %v2120_v10 }
 0x778   : > { %v2171_v13 = vmul.f32 %v2169_v12, %v2121_v53  ;;  %v2172_v15 = vpack.c.bf16 %v2170_v54, %v2170_v54 }
 0x77a   : > { %v2173_v14 = vpack.c.bf16 %v2171_v13, %v2171_v13 }
 0x77c   : > { %2410 = vmatprep.mubr.bf16.mxu1 %v2173_v14 }
 0x77d   : > { %2411 = vmatmul.mubr.bf16.vlgmr.msra.gmra.mxu1 %v2172_v15 }
 0x83d   : > { %v2412_v19 = vpop.f32.mrf.mxu1 }
 0x83e   : > { %v2413_v20 = vadd.f32 %v2412_v19, %v2211_v17 }
 0x83f   : > { %v2414_v21 = vpop.f32.mrf.mxu1 }
 0x840   : > { %v2419_v22 = vadd.f32 %v2413_v20, %v4068_v43  ;;  %v2415_v23 = vadd.f32 %v2414_v21, %v2215_v18 }
 0x841   : > { %v2416_v24 = vpop.f32.mrf.mxu1 }
 0x842   : > { %2421 = vst [vmem:[%s661_s26] sm:$0xff] %v2419_v22  ;;  %v2420_v25 = vadd.f32 %v2415_v23, %v4071_v46 }
 0x843   : > { %v2417_v0 = vpop.f32.mrf.mxu1 }
 0x844   : > { %2422 = vst [vmem:[%s661_s26 + $0x8] sm:$0xff] %v2420_v25 }
 0x845   : > { %3566 = shalt.err (!%p3563_p10)
}
 0x846   : > { %s3567_s21 = scalar_lea.hbm %s4094_s19, 256  ;;  %s3571_s24 = scalar_lea.hbm %s4219_s11, 512 }
 0x847   : > { %p3568_p12 = scmp.ne.s32.totalorder %s4094_s19, %s3567_s21  ;;  %p3572_p11 = scmp.lt.s32.totalorder %s4094_s19, %s4219_s11 }
 0x848   : > { %p3573_p2 = scmp.lt.s32.totalorder %s3571_s24, %s3567_s21 }
 0x849   : > { %p3569_p0 = pnand %p3568_p12, %p4220_p3 }
 0x84a   : > { %p3574_p9 = por %p3573_p2, %p3572_p11 }
 0x84b   : > { %p3570_p8 = pneg %p3569_p0 }
 0x84d   : > { %p3575_p1 = pnand %p3574_p9, %p3570_p8 }
 0x84f   : > { %3578 = shalt.err (!%p3575_p1)
}
 0x850   : > { %2899 = dma.vmem_to_hbm [thread:$0]  (%p4220_p3), %s2441_s5, 256, %s4094_s19, %s2424_s27  }
 0x851 PF: > { %s4221_s10 = sld [smem:[#allocation26_spill]] }
 0x852   : > { %s4222_s23 = sld [smem:[#allocation33_spill]] }
 0x853   : > { %s4223_s3 = sld [smem:[#allocation29_spill]] }
 0x857   : > { %s2452_s16 = sand.u32 1, %s4221_s10  }
 0x858   : > { %p4224_p5 = scmp.ne.s32.totalorder %s4222_s23, 0  ;;  %s2453_s26 = scalar_lea.sflag [#allocation6], %s2452_s16 }
 0x859   : > { %p4225_p7 = scmp.ge.s32.totalorder %s4223_s3, 2 }
 0x85b   : > { %p2931_p6 = pnand %p4225_p7, %p4224_p5 }
 0x85d   : > { %p2932_p4 = pneg %p2931_p6 }
 0x85f   : > { %3624 = dma.done.wait (%p2932_p4), %s2453_s26, 256  }
 0x860   : > { %3626 = vsyncadd (%p2932_p4), %s2453_s26, 4294967040  ;;  %s36_s18 = sadd.s32 1, %s4223_s3   ;;  %s4226_s4 = sld [smem:[#allocation32_spill]] }
 0x861   : > { %p33_p13 = scmp.ge.s32.totalorder %s36_s18, 4   ;;  %s4227_s16 = sld [smem:[#allocation28_spill]] }
 0x862   : > { %s4228_s17 = sld [smem:[#allocation30_spill]]  ;;  %s4229_s29 = smov %s3633_s30 }
 0x863   : > { %s4230_s30 = smov %s3637_s15  ;;  %35 = sbr.rel (!%p33_p13) target bundleno = 20 (0x14), region = 173 }
 0x866   : > { %s4231_s15 = smov %s4226_s4 }
 0x868   :  { %2458 = vsyncpa [#allocation5], 1 }
 0x869   :  { %2460 = vsyncpa [#allocation5 + $0x1], 1 }
 0x86a   :  { %2461 = vsyncpa [#allocation8], 1 }
 0x86b   :  { %2463 = vsyncpa [#allocation8 + $0x1], 1 }
 0x86c   :  { %2464 = vsyncpa [#allocation11], 1 }
 0x86d   :  { %2465 = vsyncpa [#allocation14], 1 }
 0x86e   :  { %2466 = vsyncpa [#allocation17], 1 }
 0x86f   :  { %2467 = vsyncpa [#allocation6], 1 }
 0x870   :  { %2469 = vsyncpa [#allocation6 + $0x1], 1 }

</bundles_post_ra>
